<compile_context>
chip_gen: v5e
topology: v5e:2x2
jax: 0.10.0
libtpu: 0.0.40
codegen_flags: <defaults>
</compile_context>

<pallas_src>
import functools

import jax
import jax.numpy as jnp
from jax import lax
from jax.experimental import pallas as pl
from jax.experimental.pallas import tpu as pltpu

# ---- module hyper-parameters (DQAgentWithHistory defaults) ----
OBS_DIM = 32          # state_shape = (32,)
LATENT = 128          # latent_dim default
HIDDEN = 256          # QNetwork hidden_dim default
N_ACTIONS = 4         # n_actions (example)
SEQ_LEN = 8           # small history length for the example
QPAD = 128            # n_actions padded to one full lane group for a lane-dense store
B_TILE = 8            # histories per grid step (one full sublane group)


def _dqn_kernel(hist_ref, wih_ref, whh_ref, b_ref, w1_ref, b1_ref, w2_ref, b2_ref,
                q_ref, xg_ref, *, seq_len, latent, b_tile):
    """Fused LSTM-encoder + Q-network forward for one tile of B_TILE histories.

    hist_ref: [T*B_TILE, obs_dim]   time-major inside the tile: row = t*B_TILE + k
    wih_ref:  [obs_dim, 4H]   whh_ref: [H, 4H]   b_ref: [1, 4H]     (columns: i|f|o|g)
    w1_ref:   [H, HIDDEN]     b1_ref: [1, HIDDEN]
    w2_ref:   [HIDDEN, QPAD]  b2_ref: [1, QPAD]
    q_ref (out): [B_TILE, QPAD].   Scratch: xg_ref [T*B_TILE, 4H].
    """
    H = latent
    B = b_tile

    # ---- time-batched input projection: one MXU matmul for all timesteps & the tile ----
    xg_ref[...] = (
        jnp.dot(hist_ref[...], wih_ref[...], preferred_element_type=jnp.float32)
        + b_ref[...])                                            # [T*B, 4H]  (b = b_ih+b_hh)

    whh = whh_ref[...]                                           # hoisted out of the loop
    h0 = jnp.zeros((B, H), jnp.float32)
    c0 = jnp.zeros((B, H), jnp.float32)

    # ---- serial LSTM recurrence; h/c stay vreg-resident loop carries ----
    # Gate columns were reordered offline to [i | f | o | g]; sigmoid = 0.5*(1+tanh(x/2)).
    def step(t, carry):
        h, c = carry
        row = pl.multiple_of(t * B, B)
        gates = xg_ref[pl.ds(row, B), :] + jnp.dot(
            h, whh, preferred_element_type=jnp.float32)          # [B, 4H]
        sg = 0.5 * (jnp.tanh(0.5 * gates[:, :3 * H]) + 1.0)      # sigmoid(i,f,o) in one shot
        i_g = sg[:, 0 * H:1 * H]
        f_g = sg[:, 1 * H:2 * H]
        o_g = sg[:, 2 * H:3 * H]
        g_g = jnp.tanh(gates[:, 3 * H:4 * H])
        c = f_g * c + i_g * g_g
        h = o_g * jnp.tanh(c)
        return h, c

    h, _ = lax.fori_loop(0, seq_len, step, (h0, c0), unroll=True)

    # ---- Q-network head: relu(h @ W1 + b1) @ W2 + b2 (W2/b2 zero-padded to QPAD lanes) ----
    hid = jnp.maximum(
        jnp.dot(h, w1_ref[...], preferred_element_type=jnp.float32) + b1_ref[...], 0.0)
    q_ref[...] = (jnp.dot(hid, w2_ref[...], preferred_element_type=jnp.float32)
                  + b2_ref[...]).astype(q_ref.dtype)


def _full_spec(arr):
    """Whole-array VMEM block, same block for every grid step (loaded once)."""
    nd = arr.ndim
    return pl.BlockSpec(arr.shape, lambda b, _nd=nd: (0,) * _nd)


def dq_agent_forward_batch(histories, kparams, *, n_actions=N_ACTIONS, b_tile=B_TILE):
    """histories: [B, T, obs_dim] -> Q-values [B, n_actions] (vmapped module semantics)."""
    B, T, obs = histories.shape
    n_tiles = pl.cdiv(B, b_tile)
    b_pad = n_tiles * b_tile

    # Pad batch to a whole number of tiles, then lay out each tile time-major:
    #   hist_k[tile, t*b_tile + k, :] == histories[tile*b_tile + k, t, :]
    hist_p = jnp.zeros((b_pad, T, obs), histories.dtype).at[:B].set(histories)
    hist_k = (hist_p.reshape(n_tiles, b_tile, T, obs)
              .transpose(0, 2, 1, 3)
              .reshape(n_tiles, T * b_tile, obs))

    kernel = functools.partial(_dqn_kernel, seq_len=T, latent=LATENT, b_tile=b_tile)
    weight_order = ["wih", "whh", "b", "w1", "b1", "w2", "b2"]
    weights = [kparams[name] for name in weight_order]

    q_pad = pl.pallas_call(
        kernel,
        out_shape=jax.ShapeDtypeStruct((b_pad, QPAD), jnp.float32),
        grid=(n_tiles,),
        in_specs=[pl.BlockSpec((None, T * b_tile, obs), lambda b: (b, 0, 0))]
                 + [_full_spec(w) for w in weights],
        out_specs=pl.BlockSpec((b_tile, QPAD), lambda b: (b, 0)),
        scratch_shapes=[
            pltpu.VMEM((T * b_tile, 4 * LATENT), jnp.float32),   # time-batched gate inputs
        ],
        compiler_params=pltpu.CompilerParams(
            dimension_semantics=("parallel",)),                  # v7x: shard tiles over 2 TCs
    )(hist_k, *weights)

    return q_pad[:B, :n_actions]


def dq_agent_forward(history, kparams, *, n_actions=N_ACTIONS):
    """history: [T, obs_dim] -> Q-values [n_actions] (exact DQAgentWithHistory.forward)."""
    return dq_agent_forward_batch(history[None], kparams, n_actions=n_actions)[0]


# -------------------- deterministic synthetic parameter init --------------------
def init_params(key, obs_dim=OBS_DIM, latent=LATENT, hidden=HIDDEN, n_actions=N_ACTIONS):
    """Raw parameters in PyTorch layout (W_ih:[4H,obs], W_hh:[4H,H], Linear: [out,in])."""
    ks = jax.random.split(key, 8)
    s = 0.1
    return dict(
        w_ih=s * jax.random.normal(ks[0], (4 * latent, obs_dim), jnp.float32),
        b_ih=s * jax.random.normal(ks[1], (4 * latent,), jnp.float32),
        w_hh=s * jax.random.normal(ks[2], (4 * latent, latent), jnp.float32),
        b_hh=s * jax.random.normal(ks[3], (4 * latent,), jnp.float32),
        w1=s * jax.random.normal(ks[4], (hidden, latent), jnp.float32),
        b1=s * jax.random.normal(ks[5], (hidden,), jnp.float32),
        w2=s * jax.random.normal(ks[6], (n_actions, hidden), jnp.float32),
        b2=s * jax.random.normal(ks[7], (n_actions,), jnp.float32),
    )


def _reorder_gates_ifog(w):
    """Reorder last-axis gate blocks from PyTorch [i|f|g|o] to kernel [i|f|o|g]."""
    i, f, g, o = jnp.split(w, 4, axis=-1)
    return jnp.concatenate([i, f, o, g], axis=-1)


def prep_kernel_params(raw, n_actions=N_ACTIONS, qpad=QPAD):
    """Pre-transpose to `x @ W` layout, fold biases, reorder gates, pad Q head lane-dense."""
    hidden = raw["w1"].shape[0]
    w2 = jnp.zeros((hidden, qpad), jnp.float32).at[:, :n_actions].set(raw["w2"].T)
    b2 = jnp.zeros((1, qpad), jnp.float32).at[0, :n_actions].set(raw["b2"])
    return dict(
        wih=_reorder_gates_ifog(raw["w_ih"].T),                         # [obs_dim, 4H]
        whh=_reorder_gates_ifog(raw["w_hh"].T),                         # [H, 4H]
        b=_reorder_gates_ifog((raw["b_ih"] + raw["b_hh"])[None, :]),    # [1, 4H]
        w1=raw["w1"].T,                                                 # [H, HIDDEN]
        b1=raw["b1"][None, :],                                          # [1, HIDDEN]
        w2=w2,                                                          # [HIDDEN, QPAD]
        b2=b2,                                                          # [1, QPAD]
    )


# -------------------- pure-JAX reference (for a sanity check) --------------------
def ref_forward(history, raw):
    H = raw["w_hh"].shape[1]

    def step(carry, x_t):
        h, c = carry
        gates = raw["w_ih"] @ x_t + raw["b_ih"] + raw["w_hh"] @ h + raw["b_hh"]
        i, f, g, o = jnp.split(gates, 4)
        i = jax.nn.sigmoid(i)
        f = jax.nn.sigmoid(f)
        g = jnp.tanh(g)
        o = jax.nn.sigmoid(o)
        c = f * c + i * g
        h = o * jnp.tanh(c)
        return (h, c), h

    (h, _), _ = lax.scan(step, (jnp.zeros((H,), jnp.float32),
                                jnp.zeros((H,), jnp.float32)), history)
    hid = jnp.maximum(raw["w1"] @ h + raw["b1"], 0.0)
    return raw["w2"] @ hid + raw["b2"]


# -------------------------------------- main --------------------------------------
if __name__ == "__main__":
    key = jax.random.PRNGKey(0)
    k_hist, k_par = jax.random.split(key)

    BATCH = 16  # two batch tiles -> exercises the parallel grid axis
    histories = jax.random.normal(k_hist, (BATCH, SEQ_LEN, OBS_DIM), dtype=jnp.float32)
    raw_params = init_params(k_par)
    kernel_params = prep_kernel_params(raw_params)

    # Batched path.
    q_batch = jax.block_until_ready(
        dq_agent_forward_batch(histories, kernel_params))
    assert q_batch.shape == (BATCH, N_ACTIONS), q_batch.shape

    # Single-history path (exact module signature).
    q_single = jax.block_until_ready(dq_agent_forward(histories[0], kernel_params))
    assert q_single.shape == (N_ACTIONS,), q_single.shape

    # Reference check (tight tolerance: all-f32 path, exact tanh-form sigmoid).
    q_ref = jax.block_until_ready(
        jax.vmap(lambda h: ref_forward(h, raw_params))(histories))
    max_err_batch = float(jnp.max(jnp.abs(q_batch - q_ref)))
    max_err_single = float(jnp.max(jnp.abs(q_single - q_ref[0])))
    if not (max_err_batch < 1e-4 and max_err_single < 1e-4):
        raise RuntimeError(
            f"Pallas kernel mismatch vs reference: batch={max_err_batch} single={max_err_single}")

    print("KERNEL_OK")
</pallas_src>

<mosaic_0001>
module attributes {stable_mosaic.version = 11 : i64} {
  func.func @_dqn_kernel(%arg0: i32, %arg1: memref<1x64x32xf32, #tpu.memory_space<vmem>>, %arg2: memref<32x512xf32, #tpu.memory_space<vmem>>, %arg3: memref<128x512xf32, #tpu.memory_space<vmem>>, %arg4: memref<1x512xf32, #tpu.memory_space<vmem>>, %arg5: memref<128x256xf32, #tpu.memory_space<vmem>>, %arg6: memref<1x256xf32, #tpu.memory_space<vmem>>, %arg7: memref<256x128xf32, #tpu.memory_space<vmem>>, %arg8: memref<1x128xf32, #tpu.memory_space<vmem>>, %arg9: memref<8x128xf32, #tpu.memory_space<vmem>>, %arg10: memref<64x512xf32, #tpu.memory_space<vmem>>) attributes {dimension_semantics = [#tpu.dimension_semantics<parallel>], iteration_bounds = array<i64: 2>, scalar_prefetch = 0 : i64, scratch_operands = 1 : i64, tpu.core_type = #tpu.core_type<tc>, window_params = [{transform_indices = @transform_0, window_bounds = array<i64: 1, 64, 32>}, {pipeline_mode = #tpu.pipeline_mode<synchronous>, transform_indices = @transform_1, window_bounds = array<i64: 32, 512>}, {pipeline_mode = #tpu.pipeline_mode<synchronous>, transform_indices = @transform_2, window_bounds = array<i64: 128, 512>}, {pipeline_mode = #tpu.pipeline_mode<synchronous>, transform_indices = @transform_3, window_bounds = array<i64: 1, 512>}, {pipeline_mode = #tpu.pipeline_mode<synchronous>, transform_indices = @transform_4, window_bounds = array<i64: 128, 256>}, {pipeline_mode = #tpu.pipeline_mode<synchronous>, transform_indices = @transform_5, window_bounds = array<i64: 1, 256>}, {pipeline_mode = #tpu.pipeline_mode<synchronous>, transform_indices = @transform_6, window_bounds = array<i64: 256, 128>}, {pipeline_mode = #tpu.pipeline_mode<synchronous>, transform_indices = @transform_7, window_bounds = array<i64: 1, 128>}, {transform_indices = @transform_8, window_bounds = array<i64: 8, 128>}]} {
    %c0 = arith.constant 0 : index
    %c0_0 = arith.constant 0 : index
    %c0_1 = arith.constant 0 : index
    %0 = vector.load %arg1[%c0, %c0_0, %c0_1] : memref<1x64x32xf32, #tpu.memory_space<vmem>>, vector<1x64x32xf32>
    %1 = vector.shape_cast %0 : vector<1x64x32xf32> to vector<64x32xf32>
    %c0_2 = arith.constant 0 : index
    %c0_3 = arith.constant 0 : index
    %2 = vector.load %arg2[%c0_2, %c0_3] : memref<32x512xf32, #tpu.memory_space<vmem>>, vector<32x512xf32>
    %cst = arith.constant dense<0.000000e+00> : vector<64x512xf32>
    %3 = tpu.matmul %1, %2, %cst {dimension_numbers = #tpu.dot_dimension_numbers<[1], [0], [0], [1], [0, 0, 1, 1], [], []>} : vector<64x32xf32>, vector<32x512xf32>, vector<64x512xf32> -> vector<64x512xf32>
    %c0_4 = arith.constant 0 : index
    %c0_5 = arith.constant 0 : index
    %4 = vector.load %arg4[%c0_4, %c0_5] : memref<1x512xf32, #tpu.memory_space<vmem>>, vector<1x512xf32>
    %5 = vector.broadcast %4 : vector<1x512xf32> to vector<64x512xf32>
    %6 = arith.addf %3, %5 : vector<64x512xf32>
    %c0_6 = arith.constant 0 : index
    %c0_7 = arith.constant 0 : index
    %7 = vector.load %arg10[%c0_6, %c0_7] : memref<64x512xf32, #tpu.memory_space<vmem>>, vector<64x512xf32>
    tpu.vector_store %arg10[%c0_6, %c0_7], %6 {strides = array<i32>} : memref<64x512xf32, #tpu.memory_space<vmem>>, vector<64x512xf32>,
    %c0_8 = arith.constant 0 : index
    %c0_9 = arith.constant 0 : index
    %8 = vector.load %arg3[%c0_8, %c0_9] : memref<128x512xf32, #tpu.memory_space<vmem>>, vector<128x512xf32>
    %cst_10 = arith.constant 0.000000e+00 : f32
    %9 = vector.broadcast %cst_10 : f32 to vector<8x128xf32>
    %cst_11 = arith.constant 0.000000e+00 : f32
    %10 = vector.broadcast %cst_11 : f32 to vector<8x128xf32>
    %c0_i32 = arith.constant 0 : i32
    %c8_i32 = arith.constant 8 : i32
    %11 = arith.muli %c0_i32, %c8_i32 : i32
    %12 = tpu.assume_multiple %11, 8 : i32
    %13 = arith.index_cast %12 : i32 to index
    %c0_12 = arith.constant 0 : index
    %14 = vector.load %arg10[%13, %c0_12] : memref<64x512xf32, #tpu.memory_space<vmem>>, vector<8x512xf32>
    %cst_13 = arith.constant dense<0.000000e+00> : vector<8x512xf32>
    %15 = tpu.matmul %9, %8, %cst_13 {dimension_numbers = #tpu.dot_dimension_numbers<[1], [0], [0], [1], [0, 0, 1, 1], [], []>} : vector<8x128xf32>, vector<128x512xf32>, vector<8x512xf32> -> vector<8x512xf32>
    %16 = arith.addf %14, %15 : vector<8x512xf32>
    %17 = vector.extract_strided_slice %16 {offsets = [0, 0], sizes = [8, 384], strides = [1, 1]} : vector<8x512xf32> to vector<8x384xf32>
    %cst_14 = arith.constant 5.000000e-01 : f32
    %18 = vector.broadcast %cst_14 : f32 to vector<8x384xf32>
    %19 = arith.mulf %18, %17 : vector<8x384xf32>
    %20 = math.tanh %19 : vector<8x384xf32>
    %cst_15 = arith.constant 1.000000e+00 : f32
    %21 = vector.broadcast %cst_15 : f32 to vector<8x384xf32>
    %22 = arith.addf %20, %21 : vector<8x384xf32>
    %cst_16 = arith.constant 5.000000e-01 : f32
    %23 = vector.broadcast %cst_16 : f32 to vector<8x384xf32>
    %24 = arith.mulf %23, %22 : vector<8x384xf32>
    %25 = vector.extract_strided_slice %24 {offsets = [0, 0], sizes = [8, 128], strides = [1, 1]} : vector<8x384xf32> to vector<8x128xf32>
    %26 = vector.extract_strided_slice %24 {offsets = [0, 128], sizes = [8, 128], strides = [1, 1]} : vector<8x384xf32> to vector<8x128xf32>
    %27 = vector.extract_strided_slice %24 {offsets = [0, 256], sizes = [8, 128], strides = [1, 1]} : vector<8x384xf32> to vector<8x128xf32>
    %28 = vector.extract_strided_slice %16 {offsets = [0, 384], sizes = [8, 128], strides = [1, 1]} : vector<8x512xf32> to vector<8x128xf32>
    %29 = math.tanh %28 : vector<8x128xf32>
    %30 = arith.mulf %26, %10 : vector<8x128xf32>
    %31 = arith.mulf %25, %29 : vector<8x128xf32>
    %32 = arith.addf %30, %31 : vector<8x128xf32>
    %33 = math.tanh %32 : vector<8x128xf32>
    %34 = arith.mulf %27, %33 : vector<8x128xf32>
    %c1_i32 = arith.constant 1 : i32
    %c8_i32_17 = arith.constant 8 : i32
    %35 = arith.muli %c1_i32, %c8_i32_17 : i32
    %36 = tpu.assume_multiple %35, 8 : i32
    %37 = arith.index_cast %36 : i32 to index
    %c0_18 = arith.constant 0 : index
    %38 = vector.load %arg10[%37, %c0_18] : memref<64x512xf32, #tpu.memory_space<vmem>>, vector<8x512xf32>
    %cst_19 = arith.constant dense<0.000000e+00> : vector<8x512xf32>
    %39 = tpu.matmul %34, %8, %cst_19 {dimension_numbers = #tpu.dot_dimension_numbers<[1], [0], [0], [1], [0, 0, 1, 1], [], []>} : vector<8x128xf32>, vector<128x512xf32>, vector<8x512xf32> -> vector<8x512xf32>
    %40 = arith.addf %38, %39 : vector<8x512xf32>
    %41 = vector.extract_strided_slice %40 {offsets = [0, 0], sizes = [8, 384], strides = [1, 1]} : vector<8x512xf32> to vector<8x384xf32>
    %cst_20 = arith.constant 5.000000e-01 : f32
    %42 = vector.broadcast %cst_20 : f32 to vector<8x384xf32>
    %43 = arith.mulf %42, %41 : vector<8x384xf32>
    %44 = math.tanh %43 : vector<8x384xf32>
    %cst_21 = arith.constant 1.000000e+00 : f32
    %45 = vector.broadcast %cst_21 : f32 to vector<8x384xf32>
    %46 = arith.addf %44, %45 : vector<8x384xf32>
    %cst_22 = arith.constant 5.000000e-01 : f32
    %47 = vector.broadcast %cst_22 : f32 to vector<8x384xf32>
    %48 = arith.mulf %47, %46 : vector<8x384xf32>
    %49 = vector.extract_strided_slice %48 {offsets = [0, 0], sizes = [8, 128], strides = [1, 1]} : vector<8x384xf32> to vector<8x128xf32>
    %50 = vector.extract_strided_slice %48 {offsets = [0, 128], sizes = [8, 128], strides = [1, 1]} : vector<8x384xf32> to vector<8x128xf32>
    %51 = vector.extract_strided_slice %48 {offsets = [0, 256], sizes = [8, 128], strides = [1, 1]} : vector<8x384xf32> to vector<8x128xf32>
    %52 = vector.extract_strided_slice %40 {offsets = [0, 384], sizes = [8, 128], strides = [1, 1]} : vector<8x512xf32> to vector<8x128xf32>
    %53 = math.tanh %52 : vector<8x128xf32>
    %54 = arith.mulf %50, %32 : vector<8x128xf32>
    %55 = arith.mulf %49, %53 : vector<8x128xf32>
    %56 = arith.addf %54, %55 : vector<8x128xf32>
    %57 = math.tanh %56 : vector<8x128xf32>
    %58 = arith.mulf %51, %57 : vector<8x128xf32>
    %c2_i32 = arith.constant 2 : i32
    %c8_i32_23 = arith.constant 8 : i32
    %59 = arith.muli %c2_i32, %c8_i32_23 : i32
    %60 = tpu.assume_multiple %59, 8 : i32
    %61 = arith.index_cast %60 : i32 to index
    %c0_24 = arith.constant 0 : index
    %62 = vector.load %arg10[%61, %c0_24] : memref<64x512xf32, #tpu.memory_space<vmem>>, vector<8x512xf32>
    %cst_25 = arith.constant dense<0.000000e+00> : vector<8x512xf32>
    %63 = tpu.matmul %58, %8, %cst_25 {dimension_numbers = #tpu.dot_dimension_numbers<[1], [0], [0], [1], [0, 0, 1, 1], [], []>} : vector<8x128xf32>, vector<128x512xf32>, vector<8x512xf32> -> vector<8x512xf32>
    %64 = arith.addf %62, %63 : vector<8x512xf32>
    %65 = vector.extract_strided_slice %64 {offsets = [0, 0], sizes = [8, 384], strides = [1, 1]} : vector<8x512xf32> to vector<8x384xf32>
    %cst_26 = arith.constant 5.000000e-01 : f32
    %66 = vector.broadcast %cst_26 : f32 to vector<8x384xf32>
    %67 = arith.mulf %66, %65 : vector<8x384xf32>
    %68 = math.tanh %67 : vector<8x384xf32>
    %cst_27 = arith.constant 1.000000e+00 : f32
    %69 = vector.broadcast %cst_27 : f32 to vector<8x384xf32>
    %70 = arith.addf %68, %69 : vector<8x384xf32>
    %cst_28 = arith.constant 5.000000e-01 : f32
    %71 = vector.broadcast %cst_28 : f32 to vector<8x384xf32>
    %72 = arith.mulf %71, %70 : vector<8x384xf32>
    %73 = vector.extract_strided_slice %72 {offsets = [0, 0], sizes = [8, 128], strides = [1, 1]} : vector<8x384xf32> to vector<8x128xf32>
    %74 = vector.extract_strided_slice %72 {offsets = [0, 128], sizes = [8, 128], strides = [1, 1]} : vector<8x384xf32> to vector<8x128xf32>
    %75 = vector.extract_strided_slice %72 {offsets = [0, 256], sizes = [8, 128], strides = [1, 1]} : vector<8x384xf32> to vector<8x128xf32>
    %76 = vector.extract_strided_slice %64 {offsets = [0, 384], sizes = [8, 128], strides = [1, 1]} : vector<8x512xf32> to vector<8x128xf32>
    %77 = math.tanh %76 : vector<8x128xf32>
    %78 = arith.mulf %74, %56 : vector<8x128xf32>
    %79 = arith.mulf %73, %77 : vector<8x128xf32>
    %80 = arith.addf %78, %79 : vector<8x128xf32>
    %81 = math.tanh %80 : vector<8x128xf32>
    %82 = arith.mulf %75, %81 : vector<8x128xf32>
    %c3_i32 = arith.constant 3 : i32
    %c8_i32_29 = arith.constant 8 : i32
    %83 = arith.muli %c3_i32, %c8_i32_29 : i32
    %84 = tpu.assume_multiple %83, 8 : i32
    %85 = arith.index_cast %84 : i32 to index
    %c0_30 = arith.constant 0 : index
    %86 = vector.load %arg10[%85, %c0_30] : memref<64x512xf32, #tpu.memory_space<vmem>>, vector<8x512xf32>
    %cst_31 = arith.constant dense<0.000000e+00> : vector<8x512xf32>
    %87 = tpu.matmul %82, %8, %cst_31 {dimension_numbers = #tpu.dot_dimension_numbers<[1], [0], [0], [1], [0, 0, 1, 1], [], []>} : vector<8x128xf32>, vector<128x512xf32>, vector<8x512xf32> -> vector<8x512xf32>
    %88 = arith.addf %86, %87 : vector<8x512xf32>
    %89 = vector.extract_strided_slice %88 {offsets = [0, 0], sizes = [8, 384], strides = [1, 1]} : vector<8x512xf32> to vector<8x384xf32>
    %cst_32 = arith.constant 5.000000e-01 : f32
    %90 = vector.broadcast %cst_32 : f32 to vector<8x384xf32>
    %91 = arith.mulf %90, %89 : vector<8x384xf32>
    %92 = math.tanh %91 : vector<8x384xf32>
    %cst_33 = arith.constant 1.000000e+00 : f32
    %93 = vector.broadcast %cst_33 : f32 to vector<8x384xf32>
    %94 = arith.addf %92, %93 : vector<8x384xf32>
    %cst_34 = arith.constant 5.000000e-01 : f32
    %95 = vector.broadcast %cst_34 : f32 to vector<8x384xf32>
    %96 = arith.mulf %95, %94 : vector<8x384xf32>
    %97 = vector.extract_strided_slice %96 {offsets = [0, 0], sizes = [8, 128], strides = [1, 1]} : vector<8x384xf32> to vector<8x128xf32>
    %98 = vector.extract_strided_slice %96 {offsets = [0, 128], sizes = [8, 128], strides = [1, 1]} : vector<8x384xf32> to vector<8x128xf32>
    %99 = vector.extract_strided_slice %96 {offsets = [0, 256], sizes = [8, 128], strides = [1, 1]} : vector<8x384xf32> to vector<8x128xf32>
    %100 = vector.extract_strided_slice %88 {offsets = [0, 384], sizes = [8, 128], strides = [1, 1]} : vector<8x512xf32> to vector<8x128xf32>
    %101 = math.tanh %100 : vector<8x128xf32>
    %102 = arith.mulf %98, %80 : vector<8x128xf32>
    %103 = arith.mulf %97, %101 : vector<8x128xf32>
    %104 = arith.addf %102, %103 : vector<8x128xf32>
    %105 = math.tanh %104 : vector<8x128xf32>
    %106 = arith.mulf %99, %105 : vector<8x128xf32>
    %c4_i32 = arith.constant 4 : i32
    %c8_i32_35 = arith.constant 8 : i32
    %107 = arith.muli %c4_i32, %c8_i32_35 : i32
    %108 = tpu.assume_multiple %107, 8 : i32
    %109 = arith.index_cast %108 : i32 to index
    %c0_36 = arith.constant 0 : index
    %110 = vector.load %arg10[%109, %c0_36] : memref<64x512xf32, #tpu.memory_space<vmem>>, vector<8x512xf32>
    %cst_37 = arith.constant dense<0.000000e+00> : vector<8x512xf32>
    %111 = tpu.matmul %106, %8, %cst_37 {dimension_numbers = #tpu.dot_dimension_numbers<[1], [0], [0], [1], [0, 0, 1, 1], [], []>} : vector<8x128xf32>, vector<128x512xf32>, vector<8x512xf32> -> vector<8x512xf32>
    %112 = arith.addf %110, %111 : vector<8x512xf32>
    %113 = vector.extract_strided_slice %112 {offsets = [0, 0], sizes = [8, 384], strides = [1, 1]} : vector<8x512xf32> to vector<8x384xf32>
    %cst_38 = arith.constant 5.000000e-01 : f32
    %114 = vector.broadcast %cst_38 : f32 to vector<8x384xf32>
    %115 = arith.mulf %114, %113 : vector<8x384xf32>
    %116 = math.tanh %115 : vector<8x384xf32>
    %cst_39 = arith.constant 1.000000e+00 : f32
    %117 = vector.broadcast %cst_39 : f32 to vector<8x384xf32>
    %118 = arith.addf %116, %117 : vector<8x384xf32>
    %cst_40 = arith.constant 5.000000e-01 : f32
    %119 = vector.broadcast %cst_40 : f32 to vector<8x384xf32>
    %120 = arith.mulf %119, %118 : vector<8x384xf32>
    %121 = vector.extract_strided_slice %120 {offsets = [0, 0], sizes = [8, 128], strides = [1, 1]} : vector<8x384xf32> to vector<8x128xf32>
    %122 = vector.extract_strided_slice %120 {offsets = [0, 128], sizes = [8, 128], strides = [1, 1]} : vector<8x384xf32> to vector<8x128xf32>
    %123 = vector.extract_strided_slice %120 {offsets = [0, 256], sizes = [8, 128], strides = [1, 1]} : vector<8x384xf32> to vector<8x128xf32>
    %124 = vector.extract_strided_slice %112 {offsets = [0, 384], sizes = [8, 128], strides = [1, 1]} : vector<8x512xf32> to vector<8x128xf32>
    %125 = math.tanh %124 : vector<8x128xf32>
    %126 = arith.mulf %122, %104 : vector<8x128xf32>
    %127 = arith.mulf %121, %125 : vector<8x128xf32>
    %128 = arith.addf %126, %127 : vector<8x128xf32>
    %129 = math.tanh %128 : vector<8x128xf32>
    %130 = arith.mulf %123, %129 : vector<8x128xf32>
    %c5_i32 = arith.constant 5 : i32
    %c8_i32_41 = arith.constant 8 : i32
    %131 = arith.muli %c5_i32, %c8_i32_41 : i32
    %132 = tpu.assume_multiple %131, 8 : i32
    %133 = arith.index_cast %132 : i32 to index
    %c0_42 = arith.constant 0 : index
    %134 = vector.load %arg10[%133, %c0_42] : memref<64x512xf32, #tpu.memory_space<vmem>>, vector<8x512xf32>
    %cst_43 = arith.constant dense<0.000000e+00> : vector<8x512xf32>
    %135 = tpu.matmul %130, %8, %cst_43 {dimension_numbers = #tpu.dot_dimension_numbers<[1], [0], [0], [1], [0, 0, 1, 1], [], []>} : vector<8x128xf32>, vector<128x512xf32>, vector<8x512xf32> -> vector<8x512xf32>
    %136 = arith.addf %134, %135 : vector<8x512xf32>
    %137 = vector.extract_strided_slice %136 {offsets = [0, 0], sizes = [8, 384], strides = [1, 1]} : vector<8x512xf32> to vector<8x384xf32>
    %cst_44 = arith.constant 5.000000e-01 : f32
    %138 = vector.broadcast %cst_44 : f32 to vector<8x384xf32>
    %139 = arith.mulf %138, %137 : vector<8x384xf32>
    %140 = math.tanh %139 : vector<8x384xf32>
    %cst_45 = arith.constant 1.000000e+00 : f32
    %141 = vector.broadcast %cst_45 : f32 to vector<8x384xf32>
    %142 = arith.addf %140, %141 : vector<8x384xf32>
    %cst_46 = arith.constant 5.000000e-01 : f32
    %143 = vector.broadcast %cst_46 : f32 to vector<8x384xf32>
    %144 = arith.mulf %143, %142 : vector<8x384xf32>
    %145 = vector.extract_strided_slice %144 {offsets = [0, 0], sizes = [8, 128], strides = [1, 1]} : vector<8x384xf32> to vector<8x128xf32>
    %146 = vector.extract_strided_slice %144 {offsets = [0, 128], sizes = [8, 128], strides = [1, 1]} : vector<8x384xf32> to vector<8x128xf32>
    %147 = vector.extract_strided_slice %144 {offsets = [0, 256], sizes = [8, 128], strides = [1, 1]} : vector<8x384xf32> to vector<8x128xf32>
    %148 = vector.extract_strided_slice %136 {offsets = [0, 384], sizes = [8, 128], strides = [1, 1]} : vector<8x512xf32> to vector<8x128xf32>
    %149 = math.tanh %148 : vector<8x128xf32>
    %150 = arith.mulf %146, %128 : vector<8x128xf32>
    %151 = arith.mulf %145, %149 : vector<8x128xf32>
    %152 = arith.addf %150, %151 : vector<8x128xf32>
    %153 = math.tanh %152 : vector<8x128xf32>
    %154 = arith.mulf %147, %153 : vector<8x128xf32>
    %c6_i32 = arith.constant 6 : i32
    %c8_i32_47 = arith.constant 8 : i32
    %155 = arith.muli %c6_i32, %c8_i32_47 : i32
    %156 = tpu.assume_multiple %155, 8 : i32
    %157 = arith.index_cast %156 : i32 to index
    %c0_48 = arith.constant 0 : index
    %158 = vector.load %arg10[%157, %c0_48] : memref<64x512xf32, #tpu.memory_space<vmem>>, vector<8x512xf32>
    %cst_49 = arith.constant dense<0.000000e+00> : vector<8x512xf32>
    %159 = tpu.matmul %154, %8, %cst_49 {dimension_numbers = #tpu.dot_dimension_numbers<[1], [0], [0], [1], [0, 0, 1, 1], [], []>} : vector<8x128xf32>, vector<128x512xf32>, vector<8x512xf32> -> vector<8x512xf32>
    %160 = arith.addf %158, %159 : vector<8x512xf32>
    %161 = vector.extract_strided_slice %160 {offsets = [0, 0], sizes = [8, 384], strides = [1, 1]} : vector<8x512xf32> to vector<8x384xf32>
    %cst_50 = arith.constant 5.000000e-01 : f32
    %162 = vector.broadcast %cst_50 : f32 to vector<8x384xf32>
    %163 = arith.mulf %162, %161 : vector<8x384xf32>
    %164 = math.tanh %163 : vector<8x384xf32>
    %cst_51 = arith.constant 1.000000e+00 : f32
    %165 = vector.broadcast %cst_51 : f32 to vector<8x384xf32>
    %166 = arith.addf %164, %165 : vector<8x384xf32>
    %cst_52 = arith.constant 5.000000e-01 : f32
    %167 = vector.broadcast %cst_52 : f32 to vector<8x384xf32>
    %168 = arith.mulf %167, %166 : vector<8x384xf32>
    %169 = vector.extract_strided_slice %168 {offsets = [0, 0], sizes = [8, 128], strides = [1, 1]} : vector<8x384xf32> to vector<8x128xf32>
    %170 = vector.extract_strided_slice %168 {offsets = [0, 128], sizes = [8, 128], strides = [1, 1]} : vector<8x384xf32> to vector<8x128xf32>
    %171 = vector.extract_strided_slice %168 {offsets = [0, 256], sizes = [8, 128], strides = [1, 1]} : vector<8x384xf32> to vector<8x128xf32>
    %172 = vector.extract_strided_slice %160 {offsets = [0, 384], sizes = [8, 128], strides = [1, 1]} : vector<8x512xf32> to vector<8x128xf32>
    %173 = math.tanh %172 : vector<8x128xf32>
    %174 = arith.mulf %170, %152 : vector<8x128xf32>
    %175 = arith.mulf %169, %173 : vector<8x128xf32>
    %176 = arith.addf %174, %175 : vector<8x128xf32>
    %177 = math.tanh %176 : vector<8x128xf32>
    %178 = arith.mulf %171, %177 : vector<8x128xf32>
    %c7_i32 = arith.constant 7 : i32
    %c8_i32_53 = arith.constant 8 : i32
    %179 = arith.muli %c7_i32, %c8_i32_53 : i32
    %180 = tpu.assume_multiple %179, 8 : i32
    %181 = arith.index_cast %180 : i32 to index
    %c0_54 = arith.constant 0 : index
    %182 = vector.load %arg10[%181, %c0_54] : memref<64x512xf32, #tpu.memory_space<vmem>>, vector<8x512xf32>
    %cst_55 = arith.constant dense<0.000000e+00> : vector<8x512xf32>
    %183 = tpu.matmul %178, %8, %cst_55 {dimension_numbers = #tpu.dot_dimension_numbers<[1], [0], [0], [1], [0, 0, 1, 1], [], []>} : vector<8x128xf32>, vector<128x512xf32>, vector<8x512xf32> -> vector<8x512xf32>
    %184 = arith.addf %182, %183 : vector<8x512xf32>
    %185 = vector.extract_strided_slice %184 {offsets = [0, 0], sizes = [8, 384], strides = [1, 1]} : vector<8x512xf32> to vector<8x384xf32>
    %cst_56 = arith.constant 5.000000e-01 : f32
    %186 = vector.broadcast %cst_56 : f32 to vector<8x384xf32>
    %187 = arith.mulf %186, %185 : vector<8x384xf32>
    %188 = math.tanh %187 : vector<8x384xf32>
    %cst_57 = arith.constant 1.000000e+00 : f32
    %189 = vector.broadcast %cst_57 : f32 to vector<8x384xf32>
    %190 = arith.addf %188, %189 : vector<8x384xf32>
    %cst_58 = arith.constant 5.000000e-01 : f32
    %191 = vector.broadcast %cst_58 : f32 to vector<8x384xf32>
    %192 = arith.mulf %191, %190 : vector<8x384xf32>
    %193 = vector.extract_strided_slice %192 {offsets = [0, 0], sizes = [8, 128], strides = [1, 1]} : vector<8x384xf32> to vector<8x128xf32>
    %194 = vector.extract_strided_slice %192 {offsets = [0, 128], sizes = [8, 128], strides = [1, 1]} : vector<8x384xf32> to vector<8x128xf32>
    %195 = vector.extract_strided_slice %192 {offsets = [0, 256], sizes = [8, 128], strides = [1, 1]} : vector<8x384xf32> to vector<8x128xf32>
    %196 = vector.extract_strided_slice %184 {offsets = [0, 384], sizes = [8, 128], strides = [1, 1]} : vector<8x512xf32> to vector<8x128xf32>
    %197 = math.tanh %196 : vector<8x128xf32>
    %198 = arith.mulf %194, %176 : vector<8x128xf32>
    %199 = arith.mulf %193, %197 : vector<8x128xf32>
    %200 = arith.addf %198, %199 : vector<8x128xf32>
    %201 = math.tanh %200 : vector<8x128xf32>
    %202 = arith.mulf %195, %201 : vector<8x128xf32>
    %c8_i32_59 = arith.constant 8 : i32
    %c0_60 = arith.constant 0 : index
    %c0_61 = arith.constant 0 : index
    %203 = vector.load %arg5[%c0_60, %c0_61] : memref<128x256xf32, #tpu.memory_space<vmem>>, vector<128x256xf32>
    %cst_62 = arith.constant dense<0.000000e+00> : vector<8x256xf32>
    %204 = tpu.matmul %202, %203, %cst_62 {dimension_numbers = #tpu.dot_dimension_numbers<[1], [0], [0], [1], [0, 0, 1, 1], [], []>} : vector<8x128xf32>, vector<128x256xf32>, vector<8x256xf32> -> vector<8x256xf32>
    %c0_63 = arith.constant 0 : index
    %c0_64 = arith.constant 0 : index
    %205 = vector.load %arg6[%c0_63, %c0_64] : memref<1x256xf32, #tpu.memory_space<vmem>>, vector<1x256xf32>
    %206 = vector.broadcast %205 : vector<1x256xf32> to vector<8x256xf32>
    %207 = arith.addf %204, %206 : vector<8x256xf32>
    %cst_65 = arith.constant 0.000000e+00 : f32
    %208 = vector.broadcast %cst_65 : f32 to vector<8x256xf32>
    %209 = arith.maximumf %207, %208 : vector<8x256xf32>
    %c0_66 = arith.constant 0 : index
    %c0_67 = arith.constant 0 : index
    %210 = vector.load %arg7[%c0_66, %c0_67] : memref<256x128xf32, #tpu.memory_space<vmem>>, vector<256x128xf32>
    %cst_68 = arith.constant dense<0.000000e+00> : vector<8x128xf32>
    %211 = tpu.matmul %209, %210, %cst_68 {dimension_numbers = #tpu.dot_dimension_numbers<[1], [0], [0], [1], [0, 0, 1, 1], [], []>} : vector<8x256xf32>, vector<256x128xf32>, vector<8x128xf32> -> vector<8x128xf32>
    %c0_69 = arith.constant 0 : index
    %c0_70 = arith.constant 0 : index
    %212 = vector.load %arg8[%c0_69, %c0_70] : memref<1x128xf32, #tpu.memory_space<vmem>>, vector<1x128xf32>
    %213 = vector.broadcast %212 : vector<1x128xf32> to vector<8x128xf32>
    %214 = arith.addf %211, %213 : vector<8x128xf32>
    %c0_71 = arith.constant 0 : index
    %c0_72 = arith.constant 0 : index
    %215 = vector.load %arg9[%c0_71, %c0_72] : memref<8x128xf32, #tpu.memory_space<vmem>>, vector<8x128xf32>
    tpu.vector_store %arg9[%c0_71, %c0_72], %214 {strides = array<i32>} : memref<8x128xf32, #tpu.memory_space<vmem>>, vector<8x128xf32>,
    return
  }
  func.func @transform_0(%arg0: i32) -> (i32, i32, i32) {
    %c0_i32 = arith.constant 0 : i32
    %c0_i32_0 = arith.constant 0 : i32
    %c0_i32_1 = arith.constant 0 : i32
    return %arg0, %c0_i32, %c0_i32_0 : i32, i32, i32
  }
  func.func @transform_1(%arg0: i32) -> (i32, i32) {
    %c0_i32 = arith.constant 0 : i32
    %c0_i32_0 = arith.constant 0 : i32
    %c0_i32_1 = arith.constant 0 : i32
    return %c0_i32, %c0_i32_0 : i32, i32
  }
  func.func @transform_2(%arg0: i32) -> (i32, i32) {
    %c0_i32 = arith.constant 0 : i32
    %c0_i32_0 = arith.constant 0 : i32
    %c0_i32_1 = arith.constant 0 : i32
    return %c0_i32, %c0_i32_0 : i32, i32
  }
  func.func @transform_3(%arg0: i32) -> (i32, i32) {
    %c0_i32 = arith.constant 0 : i32
    %c0_i32_0 = arith.constant 0 : i32
    %c0_i32_1 = arith.constant 0 : i32
    return %c0_i32, %c0_i32_0 : i32, i32
  }
  func.func @transform_4(%arg0: i32) -> (i32, i32) {
    %c0_i32 = arith.constant 0 : i32
    %c0_i32_0 = arith.constant 0 : i32
    %c0_i32_1 = arith.constant 0 : i32
    return %c0_i32, %c0_i32_0 : i32, i32
  }
  func.func @transform_5(%arg0: i32) -> (i32, i32) {
    %c0_i32 = arith.constant 0 : i32
    %c0_i32_0 = arith.constant 0 : i32
    %c0_i32_1 = arith.constant 0 : i32
    return %c0_i32, %c0_i32_0 : i32, i32
  }
  func.func @transform_6(%arg0: i32) -> (i32, i32) {
    %c0_i32 = arith.constant 0 : i32
    %c0_i32_0 = arith.constant 0 : i32
    %c0_i32_1 = arith.constant 0 : i32
    return %c0_i32, %c0_i32_0 : i32, i32
  }
  func.func @transform_7(%arg0: i32) -> (i32, i32) {
    %c0_i32 = arith.constant 0 : i32
    %c0_i32_0 = arith.constant 0 : i32
    %c0_i32_1 = arith.constant 0 : i32
    return %c0_i32, %c0_i32_0 : i32, i32
  }
  func.func @transform_8(%arg0: i32) -> (i32, i32) {
    %c0_i32 = arith.constant 0 : i32
    %c0_i32_0 = arith.constant 0 : i32
    return %arg0, %c0_i32 : i32, i32
  }
}

</mosaic_0001>

<bundles_post_ra>
// kernel: tpu_custom_call.1
= control target key start
LH: loop header
LB: loop body
LE: loop exit
PB: predicated region body
PF: predicated region fallthrough
CT: control target
= control target key end

     0   :  { %s3428_s0 = inlined_call_operand.vmem [shape: f32[2,64,32], index: 0, kind: input, shape index: {}]   ;;  %s3429_s1 = inlined_call_operand.vmem [shape: f32[32,512], index: 1, kind: input, shape index: {}]   ;;  %s3430_s2 = inlined_call_operand.hbm [shape: f32[128,512], index: 2, kind: input, shape index: {}]   ;;  %s3431_s3 = inlined_call_operand.vmem [shape: f32[1,512], index: 3, kind: input, shape index: {}]   ;;  %s3432_s4 = inlined_call_operand.hbm [shape: f32[128,256], index: 4, kind: input, shape index: {}]   ;;  %s3433_s5 = inlined_call_operand.vmem [shape: f32[1,256], index: 5, kind: input, shape index: {}]   ;;  %s3434_s6 = inlined_call_operand.hbm [shape: f32[256,128], index: 6, kind: input, shape index: {}]   ;;  %s3435_s7 = inlined_call_operand.vmem [shape: f32[1,128], index: 7, kind: input, shape index: {}]   ;;  %s3436_s8 = inlined_call_operand.hbm [shape: f32[16,128], index: 8, kind: output, shape index: {}]  }
   0x1   :  { %3530 = sst [smem:[#allocation68_spill]] %s3430_s2 }
   0x2   :  { %3531 = sst [smem:[#allocation69_spill]] %s3432_s4 }
   0x3   :  { %13 = vsyncpa [#allocation4], 0 }
   0x4   :  { %14 = vsyncpa [#allocation7], 0 }
   0x5   :  { %15 = vsyncpa [#allocation5], 0 }
   0x6   :  { %17 = vsyncpa [#allocation5 + $0x1], 0  ;;  %s2304_s27 = smov 0   ;;  %s2306_s28 = smov 0  }
   0x7   :  { %s2308_s29 = smov 0   ;;  %s2310_s30 = smov 0  }
   0x8 LB: > { %3532 = sst [smem:[#allocation13_spill]] %s2243_s29  ;;  %s2325_s9 = sadd.s32 4294967295, %s2247_s30   ;;  %s2247_s30 = sphi %s2310_s30, %s3727_s30   ;;  %s2243_s29 = sphi %s2308_s29, %s3729_s29   ;;  %s2239_s28 = sphi %s2306_s28, %s3731_s28   ;;  %s2235_s27 = sphi %s2304_s27, %s3730_s27  }
   0x9   : > { %s1815_s10 = sadd.s32 4294967294, %s2247_s30   ;;  %s2329_s11 = sadd.s32 1, %s2247_s30  }
   0xa   : > { %3533 = sst [smem:[#allocation14_spill]] %s2329_s11  ;;  %s203_s12 = sadd.s32 1, %s2243_s29 }
   0xb   : > { %s200_s13 = ssub.s32 %s2247_s30, %s2329_s11  ;;  %p213_p0 = scmp.ne.s32.totalorder %s2243_s29, %s2239_s28 }
   0xc   : > { %p201_p1 = scmp.eq.s32.totalorder %s200_s13, 0  ;;  %p214_p2 = scmp.eq.s32.totalorder %s2325_s9, 1 }
   0xd   : > { %p219_p3 = scmp.ne.s32.totalorder %s2239_s28, %s2235_s27  ;;  %p220_p4 = scmp.eq.s32.totalorder %s1815_s10, 1 }
   0xe   : > { %s2340_s14 = scalar_select %p201_p1, %s2243_s29, %s203_s12  }
   0xf   : > { %p2342_p5 = por %p214_p2, %p213_p0  ;;  %p2346_p6 = por %p220_p4, %p219_p3 }
  0x10   : > { %3534 = sst [smem:[#allocation15_spill]] %s2340_s14  ;;  %p1816_p7 = scmp.ge.s32.totalorder %s2247_s30, 1 }
  0x11   : > { %p227_p8 = scmp.lt.s32.totalorder %s2247_s30, 3  ;;  %p1893_p9 = scmp.eq.s32.totalorder %s2325_s9, 0 }
  0x12   : > { %s3538_s4 = sld [smem:[#allocation69_spill]]  ;;  %s2249_s21 = smov [#allocation6]  }
  0x13   : > { %p2353_p10 = pnand %p1816_p7, %p227_p8  ;;  %s260_s22 = sshll.u32 %s2249_s21, 4  ;;  %s261_s22 = int_to_ptr.vmem [resolvable:$true] %s260_s22 }
  0x14   : > { %s3540_s2 = sld [smem:[#allocation68_spill]]  ;;  %s2250_s10 = smov 256  }
  0x15   : > { %p1879_p11 = pneg %p2353_p10  ;;  %s2251_s12 = smov 16  }
  0x16   : > { %s2252_s13 = smov [#allocation3]   ;;  %s2253_s19 = smov 512  }
  0x17   : > { %p2364_p12 = pnand %p1893_p9, %p1879_p11  ;;  %s243_s18 = sshll.u32 %s2252_s13, 4  ;;  %s244_s18 = int_to_ptr.vmem [resolvable:$true] %s243_s18 }
  0x18   : > { %s258_s20 = sshll.u32 %s3538_s4, 4  ;;  %s2254_s21 = smov 32   ;;  %s259_s20 = int_to_ptr.hbm [resolvable:$true] %s258_s20 }
  0x19   : > { %1885 = dma.hbm_to_vmem [thread:$0]  (!%p2364_p12), %s259_s20, 4096, %s261_s22, [#allocation7], %s2250_s10, %s2250_s10, %s2251_s12  }
  0x1a   : > { %s241_s26 = sshll.u32 %s3540_s2, 4  ;;  %s275_s24 = sshll.u32 %s3434_s6, 4  ;;  %s242_s26 = int_to_ptr.hbm [resolvable:$true] %s241_s26  ;;  %s276_s24 = int_to_ptr.hbm [resolvable:$true] %s275_s24 }
  0x1b   : > { %1882 = dma.hbm_to_vmem [thread:$0]  (!%p2364_p12), %s242_s26, 8192, %s244_s18, [#allocation4], %s2253_s19, %s2253_s19, %s2254_s21  }
  0x1c   : > { %s2255_s25 = smov [#allocation8]   ;;  %s2256_s29 = smov 128  }
  0x1d   : > { %s277_s2 = sshll.u32 %s2255_s25, 4  ;;  %s2257_s11 = smov 8   ;;  %s278_s2 = int_to_ptr.vmem [resolvable:$true] %s277_s2 }
  0x1e   : > { %1888 = dma.hbm_to_vmem [thread:$0]  (!%p2364_p12), %s276_s24, 4096, %s278_s2, [#allocation7], %s2256_s29, %s2256_s29, %s2257_s11  }
  0x1f   : > { %304 = sbr.rel (%p2353_p10) target bundleno = 1621 (0x655), region = 52 }
  0x24   : > { %2222 = dma.done.wait (%p1893_p9), [#allocation4], 8192  }
  0x25   : > { %2224 = vsyncadd (%p1893_p9), [#allocation4], 4294959104 }
  0x26   : > { %2226 = dma.done.wait (%p1893_p9), [#allocation7], 8192  }
  0x27   : > { %2228 = vsyncadd (%p1893_p9), [#allocation7], 4294959104  ;;  %p349_p13 = scmp.lt.s32.totalorder %s2325_s9, 1  ;;  %v374_v0 = vld [vmem:[%s3429_s1 + $0x60] sm:$0xff]  ;;  %v375_v1 = vld [vmem:[%s3429_s1 + $0x68] sm:$0xff]  ;;  %vm388_vm0 = vcmask 261120  }
  0x28   : > { %v376_v2 = vld [vmem:[%s3429_s1 + $0x70] sm:$0xff]  ;;  %425 = vmatpush.msra.mxu0 %v374_v0  ;;  %466 = vmatpush.msra.mxu1 %v375_v1  ;;  %v377_v3 = vld [vmem:[%s3429_s1 + $0x78] sm:$0xff]  ;;  %v370_v4 = vld [vmem:[%s3429_s1 + $0x40] sm:$0xff]  ;;  %s346_s17 = sand.u32 1, %s2239_s28   ;;  %s1861_s23 = sshll.u32 %s2325_s9, 3 }
  0x29   : > { %s350_s4 = scalar_select %p349_p13, %s2325_s9, 1  ;;  %v371_v5 = vld [vmem:[%s3429_s1 + $0x48] sm:$0xff]  ;;  %507 = vmatpush.msra.mxu2 %v376_v2  ;;  %548 = vmatpush.msra.mxu3 %v377_v3  ;;  %v372_v6 = vld [vmem:[%s3429_s1 + $0x50] sm:$0xff]  ;;  %v373_v7 = vld [vmem:[%s3429_s1 + $0x58] sm:$0xff] }
  0x2a   : > { %v366_v8 = vld [vmem:[%s3429_s1 + $0x20] sm:$0xff]  ;;  %426 = vmatpush.msra.mxu0 %v370_v4  ;;  %467 = vmatpush.msra.mxu1 %v371_v5  ;;  %v367_v9 = vld [vmem:[%s3429_s1 + $0x28] sm:$0xff]  ;;  %v368_v10 = vld [vmem:[%s3429_s1 + $0x30] sm:$0xff]  ;;  %s1825_s20 = sshll.u32 %s346_s17, 3  ;;  %s1713_s18 = scalar_lea.hbm %s3436_s8, %s1861_s23 }
  0x2b   : > { %s1864_s22 = sshll.u32 %s350_s4, 6  ;;  %v369_v11 = vld [vmem:[%s3429_s1 + $0x38] sm:$0xff]  ;;  %508 = vmatpush.msra.mxu2 %v372_v6  ;;  %549 = vmatpush.msra.mxu3 %v373_v7  ;;  %v362_v12 = vld [vmem:[%s3429_s1] sm:$0xff]  ;;  %v363_v13 = vld [vmem:[%s3429_s1 + $0x8] sm:$0xff]  ;;  %s348_s19 = scalar_lea.vmem [#allocation9], %s1825_s20 }
  0x2c   : > { %s2431_s12 = scalar_lea.vmem %s3428_s0, %s1864_s22  ;;  %427 = vmatpush.msra.mxu0 %v366_v8  ;;  %468 = vmatpush.msra.mxu1 %v367_v9  ;;  %v364_v14 = vld [vmem:[%s3429_s1 + $0x10] sm:$0xff]  ;;  %v365_v15 = vld [vmem:[%s3429_s1 + $0x18] sm:$0xff]  ;;  %v2446_v17 = vld [vmem:[#allocation3 + $0x1e0] sm:$0xff]  ;;  %s1715_s21 = sshll.u32 %s348_s19, 4  ;;  %s1716_s21 = int_to_ptr.vmem [resolvable:$true] %s1715_s21 }
  0x2d   : > { %509 = vmatpush.msra.mxu2 %v368_v10  ;;  %550 = vmatpush.msra.mxu3 %v369_v11  ;;  %v354_v16 = vld [vmem:[%s2431_s12] sm:$0xff]  ;;  %v2448_v18 = vld [vmem:[#allocation3 + $0x1e8] sm:$0xff]  ;;  %v2452_v19 = vld [vmem:[#allocation3 + $0x1f8] sm:$0xff]  ;;  %s1717_s24 = sshll.u32 %s1713_s18, 4  ;;  %s1703_s9 = scalar_lea.sflag [#allocation5], %s346_s17  ;;  %s1718_s24 = int_to_ptr.hbm [resolvable:$true] %s1717_s24 }
  0x2e   : > { %428 = vmatpush.msra.mxu0 %v362_v12  ;;  %469 = vmatpush.msra.mxu1 %v363_v13  ;;  %v2454_v20 = vld [vmem:[#allocation3 + $0x1f0] sm:$0xff]  ;;  %v2458_v21 = vld [vmem:[#allocation3 + $0x1c0] sm:$0xff]  ;;  %v2460_v22 = vld [vmem:[#allocation3 + $0x1c8] sm:$0xff]  ;;  %s2191_s25 = sshra.s32 %s1718_s24, 4  ;;  %s2197_s29 = scalar_lea.hbm %s3436_s8, 16  ;;  %s2192_s25 = int_to_ptr.hbm [resolvable:$true] %s2191_s25 }
  0x2f   : > { %510 = vmatpush.msra.mxu2 %v364_v14  ;;  %551 = vmatpush.msra.mxu3 %v365_v15  ;;  %v2464_v23 = vld [vmem:[#allocation3 + $0x1d8] sm:$0xff]  ;;  %v2466_v24 = vld [vmem:[#allocation3 + $0x1d0] sm:$0xff]  ;;  %v2470_v25 = vld [vmem:[#allocation3 + $0x1a0] sm:$0xff]  ;;  %s2193_s4 = scalar_lea.hbm %s2192_s25, 8  ;;  %p2198_p3 = scmp.lt.s32.totalorder %s2192_s25, %s3436_s8 }
  0x30   : > { %1828 = vmatmul.msk.f32.vlgmr.msra.gmra.mxu0 %vm388_vm0, %v354_v16  ;;  %1836 = vmatmul.msk.f32.vlgmr.msra.gmra.mxu1 %vm388_vm0, %v354_v16  ;;  %v2472_v26 = vld [vmem:[#allocation3 + $0x1a8] sm:$0xff]  ;;  %v2476_v27 = vld [vmem:[#allocation3 + $0x1b8] sm:$0xff]  ;;  %v2478_v28 = vld [vmem:[#allocation3 + $0x1b0] sm:$0xff]  ;;  %p2194_p0 = scmp.ne.s32.totalorder %s2192_s25, %s2193_s4  ;;  %p2199_p4 = scmp.lt.s32.totalorder %s2197_s29, %s2193_s4 }
  0x31   : > { %1844 = vmatmul.msk.f32.vlgmr.msra.gmra.mxu2 %vm388_vm0, %v354_v16  ;;  %1852 = vmatmul.msk.f32.vlgmr.msra.gmra.mxu3 %vm388_vm0, %v354_v16  ;;  %v355_v29 = vld [vmem:[%s2431_s12 + $0x8] sm:$0xff]  ;;  %v2486_v30 = vld [vmem:[#allocation3 + $0x180] sm:$0xff]  ;;  %v2493_v32 = vld [vmem:[#allocation3 + $0x198] sm:$0xff] }
  0x32   : > { %680 = vmatpush.msrb.mxu0 %v2446_v17  ;;  %700 = vmatpush.msrb.mxu1 %v2448_v18  ;;  %v2488_v31 = vld [vmem:[#allocation3 + $0x188] sm:$0xff]  ;;  %v2495_v33 = vld [vmem:[#allocation3 + $0x190] sm:$0xff]  ;;  %v2499_v34 = vld [vmem:[#allocation3 + $0x160] sm:$0xff]  ;;  %p2195_p1 = pnand %p2194_p0, %p2342_p5  ;;  %p2200_p7 = por %p2199_p4, %p2198_p3 }
  0x33   : > { %740 = vmatpush.msrb.mxu3 %v2452_v19  ;;  %720 = vmatpush.msrb.mxu2 %v2454_v20  ;;  %v2501_v35 = vld [vmem:[#allocation3 + $0x168] sm:$0xff]  ;;  %v2505_v36 = vld [vmem:[#allocation3 + $0x178] sm:$0xff]  ;;  %v2507_v37 = vld [vmem:[#allocation3 + $0x170] sm:$0xff] }
  0x34   : > { %681 = vmatpush.msrb.mxu0 %v2458_v21  ;;  %701 = vmatpush.msrb.mxu1 %v2460_v22  ;;  %v2511_v38 = vld [vmem:[#allocation3 + $0x140] sm:$0xff]  ;;  %v2513_v39 = vld [vmem:[#allocation3 + $0x148] sm:$0xff]  ;;  %v2517_v40 = vld [vmem:[#allocation3 + $0x158] sm:$0xff]  ;;  %p2196_p2 = pneg %p2195_p1 }
  0x35   : > { %741 = vmatpush.msrb.mxu3 %v2464_v23  ;;  %721 = vmatpush.msrb.mxu2 %v2466_v24  ;;  %v2519_v41 = vld [vmem:[#allocation3 + $0x150] sm:$0xff]  ;;  %v2527_v43 = vld [vmem:[#allocation3 + $0x120] sm:$0xff]  ;;  %v2529_v44 = vld [vmem:[#allocation3 + $0x128] sm:$0xff] }
  0x36   : > { %682 = vmatpush.msrb.mxu0 %v2470_v25  ;;  %702 = vmatpush.msrb.mxu1 %v2472_v26  ;;  %v356_v42 = vld [vmem:[%s2431_s12 + $0x10] sm:$0xff]  ;;  %v2534_v45 = vld [vmem:[#allocation3 + $0x138] sm:$0xff]  ;;  %v2540_v47 = vld [vmem:[#allocation3 + $0x100] sm:$0xff]  ;;  %p2201_p8 = pnand %p2200_p7, %p2196_p2 }
  0x37   : > { %742 = vmatpush.msrb.mxu3 %v2476_v27  ;;  %722 = vmatpush.msrb.mxu2 %v2478_v28  ;;  %v2536_v46 = vld [vmem:[#allocation3 + $0x130] sm:$0xff]  ;;  %v2542_v48 = vld [vmem:[#allocation3 + $0x108] sm:$0xff]  ;;  %v2546_v49 = vld [vmem:[#allocation3 + $0x118] sm:$0xff] }
  0x38   : > { %1829 = vmatmul.msk.f32.gmra.mxu0 %vm388_vm0, %v355_v29  ;;  %1837 = vmatmul.msk.f32.gmra.mxu1 %vm388_vm0, %v355_v29  ;;  %v2548_v50 = vld [vmem:[#allocation3 + $0x110] sm:$0xff]  ;;  %v2552_v51 = vld [vmem:[#allocation3 + $0xe0] sm:$0xff]  ;;  %v2554_v52 = vld [vmem:[#allocation3 + $0xe8] sm:$0xff] }
  0x39   : > { %1845 = vmatmul.msk.f32.gmra.mxu2 %vm388_vm0, %v355_v29  ;;  %1853 = vmatmul.msk.f32.gmra.mxu3 %vm388_vm0, %v355_v29  ;;  %v2558_v53 = vld [vmem:[#allocation3 + $0xf8] sm:$0xff]  ;;  %v2560_v54 = vld [vmem:[#allocation3 + $0xf0] sm:$0xff]  ;;  %v2568_v56 = vld [vmem:[#allocation3 + $0xc0] sm:$0xff] }
  0x3a   : > { %683 = vmatpush.msrb.mxu0 %v2486_v30  ;;  %703 = vmatpush.msrb.mxu1 %v2488_v31  ;;  %v357_v55 = vld [vmem:[%s2431_s12 + $0x18] sm:$0xff]  ;;  %v2570_v57 = vld [vmem:[#allocation3 + $0xc8] sm:$0xff]  ;;  %v2577_v59 = vld [vmem:[#allocation3 + $0xd0] sm:$0xff] }
  0x3b   : > { %743 = vmatpush.msrb.mxu3 %v2493_v32  ;;  %723 = vmatpush.msrb.mxu2 %v2495_v33  ;;  %v2575_v58 = vld [vmem:[#allocation3 + $0xd8] sm:$0xff]  ;;  %v2581_v60 = vld [vmem:[#allocation3 + $0xa0] sm:$0xff]  ;;  %v2583_v61 = vld [vmem:[#allocation3 + $0xa8] sm:$0xff] }
  0x3c   : > { %684 = vmatpush.msrb.mxu0 %v2499_v34  ;;  %704 = vmatpush.msrb.mxu1 %v2501_v35  ;;  %3541 = vst [vmem:[#allocation16_spill] sm:$0xff] %v2581_v60  ;;  %v2587_v62 = vld [vmem:[#allocation3 + $0xb8] sm:$0xff]  ;;  %v2589_v63 = vld [vmem:[#allocation3 + $0xb0] sm:$0xff]  ;;  %v2593_v0 = vld [vmem:[#allocation3 + $0x80] sm:$0xff] }
  0x3d   : > { %744 = vmatpush.msrb.mxu3 %v2505_v36  ;;  %724 = vmatpush.msrb.mxu2 %v2507_v37  ;;  %3542 = vst [vmem:[#allocation17_spill] sm:$0xff] %v2583_v61  ;;  %v2595_v1 = vld [vmem:[#allocation3 + $0x88] sm:$0xff]  ;;  %v2599_v2 = vld [vmem:[#allocation3 + $0x98] sm:$0xff]  ;;  %v2601_v3 = vld [vmem:[#allocation3 + $0x90] sm:$0xff] }
  0x3e   : > { %685 = vmatpush.msrb.mxu0 %v2511_v38  ;;  %705 = vmatpush.msrb.mxu1 %v2513_v39  ;;  %3543 = vst [vmem:[#allocation18_spill] sm:$0xff] %v2587_v62  ;;  %v358_v4 = vld [vmem:[%s2431_s12 + $0x20] sm:$0xff]  ;;  %v2611_v6 = vld [vmem:[#allocation3 + $0x68] sm:$0xff]  ;;  %v2616_v7 = vld [vmem:[#allocation3 + $0x78] sm:$0xff] }
  0x3f   : > { %745 = vmatpush.msrb.mxu3 %v2517_v40  ;;  %725 = vmatpush.msrb.mxu2 %v2519_v41  ;;  %3544 = vst [vmem:[#allocation19_spill] sm:$0xff] %v2589_v63  ;;  %v2609_v5 = vld [vmem:[#allocation3 + $0x60] sm:$0xff]  ;;  %v2618_v8 = vld [vmem:[#allocation3 + $0x70] sm:$0xff]  ;;  %v2624_v10 = vld [vmem:[#allocation3 + $0x48] sm:$0xff] }
  0x40   : > { %1830 = vmatmul.msk.f32.gmra.mxu0 %vm388_vm0, %v356_v42  ;;  %1838 = vmatmul.msk.f32.gmra.mxu1 %vm388_vm0, %v356_v42  ;;  %3545 = vst [vmem:[#allocation20_spill] sm:$0xff] %v2593_v0  ;;  %v2622_v9 = vld [vmem:[#allocation3 + $0x40] sm:$0xff]  ;;  %v2628_v11 = vld [vmem:[#allocation3 + $0x58] sm:$0xff]  ;;  %v2630_v12 = vld [vmem:[#allocation3 + $0x50] sm:$0xff] }
  0x41   : > { %1846 = vmatmul.msk.f32.gmra.mxu2 %vm388_vm0, %v356_v42  ;;  %1854 = vmatmul.msk.f32.gmra.mxu3 %vm388_vm0, %v356_v42  ;;  %3546 = vst [vmem:[#allocation21_spill] sm:$0xff] %v2595_v1  ;;  %v2634_v13 = vld [vmem:[#allocation3 + $0x20] sm:$0xff]  ;;  %v2636_v14 = vld [vmem:[#allocation3 + $0x28] sm:$0xff]  ;;  %v2640_v15 = vld [vmem:[#allocation3 + $0x38] sm:$0xff] }
  0x42   : > { %686 = vmatpush.msrb.mxu0 %v2527_v43  ;;  %706 = vmatpush.msrb.mxu1 %v2529_v44  ;;  %3547 = vst [vmem:[#allocation22_spill] sm:$0xff] %v2599_v2  ;;  %v2642_v16 = vld [vmem:[#allocation3 + $0x30] sm:$0xff]  ;;  %v359_v29 = vld [vmem:[%s2431_s12 + $0x28] sm:$0xff]  ;;  %v2650_v42 = vld [vmem:[#allocation3] sm:$0xff] }
  0x43   : > { %746 = vmatpush.msrb.mxu3 %v2534_v45  ;;  %726 = vmatpush.msrb.mxu2 %v2536_v46  ;;  %3548 = vst [vmem:[#allocation23_spill] sm:$0xff] %v2601_v3 }
  0x44   : > { %687 = vmatpush.msrb.mxu0 %v2540_v47  ;;  %707 = vmatpush.msrb.mxu1 %v2542_v48  ;;  %3549 = vst [vmem:[#allocation24_spill] sm:$0xff] %v2609_v5 }
  0x45   : > { %747 = vmatpush.msrb.mxu3 %v2546_v49  ;;  %727 = vmatpush.msrb.mxu2 %v2548_v50  ;;  %3550 = vst [vmem:[#allocation25_spill] sm:$0xff] %v2611_v6 }
  0x46   : > { %688 = vmatpush.msrb.mxu0 %v2552_v51  ;;  %708 = vmatpush.msrb.mxu1 %v2554_v52  ;;  %3551 = vst [vmem:[#allocation26_spill] sm:$0xff] %v2616_v7 }
  0x47   : > { %748 = vmatpush.msrb.mxu3 %v2558_v53  ;;  %728 = vmatpush.msrb.mxu2 %v2560_v54  ;;  %3552 = vst [vmem:[#allocation27_spill] sm:$0xff] %v2618_v8 }
  0x48   : > { %1831 = vmatmul.msk.f32.gmra.mxu0 %vm388_vm0, %v357_v55  ;;  %1839 = vmatmul.msk.f32.gmra.mxu1 %vm388_vm0, %v357_v55  ;;  %3553 = vst [vmem:[#allocation28_spill] sm:$0xff] %v2622_v9 }
  0x49   : > { %1847 = vmatmul.msk.f32.gmra.mxu2 %vm388_vm0, %v357_v55  ;;  %1855 = vmatmul.msk.f32.gmra.mxu3 %vm388_vm0, %v357_v55  ;;  %3554 = vst [vmem:[#allocation29_spill] sm:$0xff] %v2624_v10  ;;  %v2652_v55 = vld [vmem:[#allocation3 + $0x8] sm:$0xff] }
  0x4a   : > { %689 = vmatpush.msrb.mxu0 %v2568_v56  ;;  %709 = vmatpush.msrb.mxu1 %v2570_v57  ;;  %3555 = vst [vmem:[#allocation30_spill] sm:$0xff] %v2628_v11 }
  0x4b   : > { %749 = vmatpush.msrb.mxu3 %v2575_v58  ;;  %729 = vmatpush.msrb.mxu2 %v2577_v59  ;;  %3556 = vst [vmem:[#allocation31_spill] sm:$0xff] %v2630_v12 }
  0x4c   : > { %690 = vmatpush.msrb.mxu0 %v2581_v60  ;;  %710 = vmatpush.msrb.mxu1 %v2583_v61  ;;  %3557 = vst [vmem:[#allocation32_spill] sm:$0xff] %v2634_v13 }
  0x4d   : > { %750 = vmatpush.msrb.mxu3 %v2587_v62  ;;  %730 = vmatpush.msrb.mxu2 %v2589_v63  ;;  %3558 = vst [vmem:[#allocation33_spill] sm:$0xff] %v2636_v14 }
  0x4e   : > { %691 = vmatpush.msrb.mxu0 %v2593_v0  ;;  %711 = vmatpush.msrb.mxu1 %v2595_v1  ;;  %3559 = vst [vmem:[#allocation34_spill] sm:$0xff] %v2640_v15 }
  0x4f   : > { %751 = vmatpush.msrb.mxu3 %v2599_v2  ;;  %731 = vmatpush.msrb.mxu2 %v2601_v3  ;;  %3560 = vst [vmem:[#allocation35_spill] sm:$0xff] %v2642_v16 }
  0x50   : > { %1832 = vmatmul.msk.f32.gmra.mxu0 %vm388_vm0, %v358_v4  ;;  %1840 = vmatmul.msk.f32.gmra.mxu1 %vm388_vm0, %v358_v4  ;;  %3561 = vst [vmem:[#allocation36_spill] sm:$0xff] %v2650_v42 }
  0x51   : > { %1848 = vmatmul.msk.f32.gmra.mxu2 %vm388_vm0, %v358_v4  ;;  %1856 = vmatmul.msk.f32.gmra.mxu3 %vm388_vm0, %v358_v4  ;;  %3562 = vst [vmem:[#allocation37_spill] sm:$0xff] %v2652_v55  ;;  %v2657_v4 = vld [vmem:[#allocation3 + $0x18] sm:$0xff] }
  0x52   : > { %692 = vmatpush.msrb.mxu0 %v2609_v5  ;;  %712 = vmatpush.msrb.mxu1 %v2611_v6  ;;  %3563 = vst [vmem:[#allocation38_spill] sm:$0xff] %v2657_v4 }
  0x53   : > { %752 = vmatpush.msrb.mxu3 %v2616_v7  ;;  %732 = vmatpush.msrb.mxu2 %v2618_v8 }
  0x54   : > { %693 = vmatpush.msrb.mxu0 %v2622_v9  ;;  %713 = vmatpush.msrb.mxu1 %v2624_v10 }
  0x55   : > { %753 = vmatpush.msrb.mxu3 %v2628_v11  ;;  %733 = vmatpush.msrb.mxu2 %v2630_v12  ;;  %v2659_v11 = vld [vmem:[#allocation3 + $0x10] sm:$0xff] }
  0x56   : > { %694 = vmatpush.msrb.mxu0 %v2634_v13  ;;  %714 = vmatpush.msrb.mxu1 %v2636_v14  ;;  %3564 = vst [vmem:[#allocation39_spill] sm:$0xff] %v2659_v11 }
  0x57   : > { %754 = vmatpush.msrb.mxu3 %v2640_v15  ;;  %734 = vmatpush.msrb.mxu2 %v2642_v16  ;;  %v360_v15 = vld [vmem:[%s2431_s12 + $0x30] sm:$0xff] }
  0x58   : > { %1833 = vmatmul.msk.f32.gmra.mxu0 %vm388_vm0, %v359_v29  ;;  %1841 = vmatmul.msk.f32.gmra.mxu1 %vm388_vm0, %v359_v29 }
  0x59   : > { %1849 = vmatmul.msk.f32.gmra.mxu2 %vm388_vm0, %v359_v29  ;;  %1857 = vmatmul.msk.f32.gmra.mxu3 %vm388_vm0, %v359_v29  ;;  %v361_v29 = vld [vmem:[%s2431_s12 + $0x38] sm:$0xff] }
  0x5a   : > { %695 = vmatpush.msrb.mxu0 %v2650_v42  ;;  %715 = vmatpush.msrb.mxu1 %v2652_v55 }
  0x5b   : > { %755 = vmatpush.msrb.mxu3 %v2657_v4  ;;  %735 = vmatpush.msrb.mxu2 %v2659_v11 }
  0x5c   : > { %789 = vmatpush.msra.mxu0 %v2446_v17  ;;  %809 = vmatpush.msra.mxu1 %v2448_v18 }
  0x5d   : > { %829 = vmatpush.msra.mxu2 %v2454_v20  ;;  %849 = vmatpush.msra.mxu3 %v2452_v19 }
  0x5e   : > { %790 = vmatpush.msra.mxu0 %v2458_v21  ;;  %810 = vmatpush.msra.mxu1 %v2460_v22 }
  0x5f   : > { %830 = vmatpush.msra.mxu2 %v2466_v24  ;;  %850 = vmatpush.msra.mxu3 %v2464_v23 }
  0x60   : > { %1834 = vmatmul.msk.f32.gmra.mxu0 %vm388_vm0, %v360_v15  ;;  %1842 = vmatmul.msk.f32.gmra.mxu1 %vm388_vm0, %v360_v15 }
  0x61   : > { %1850 = vmatmul.msk.f32.gmra.mxu2 %vm388_vm0, %v360_v15  ;;  %1858 = vmatmul.msk.f32.gmra.mxu3 %vm388_vm0, %v360_v15  ;;  %v2258_v15 = vmov 0.0  }
  0x62   : > { %791 = vmatpush.msra.mxu0 %v2470_v25  ;;  %811 = vmatpush.msra.mxu1 %v2472_v26 }
  0x63   : > { %831 = vmatpush.msra.mxu2 %v2478_v28  ;;  %851 = vmatpush.msra.mxu3 %v2476_v27 }
  0x64   : > { %792 = vmatpush.msra.mxu0 %v2486_v30  ;;  %812 = vmatpush.msra.mxu1 %v2488_v31 }
  0x65   : > { %832 = vmatpush.msra.mxu2 %v2495_v33  ;;  %852 = vmatpush.msra.mxu3 %v2493_v32 }
  0x66   : > { %793 = vmatpush.msra.mxu0 %v2499_v34  ;;  %813 = vmatpush.msra.mxu1 %v2501_v35 }
  0x67   : > { %833 = vmatpush.msra.mxu2 %v2507_v37  ;;  %853 = vmatpush.msra.mxu3 %v2505_v36 }
  0x68   : > { %1835 = vmatmul.msk.f32.gmra.mxu0 %vm388_vm0, %v361_v29  ;;  %1843 = vmatmul.msk.f32.gmra.mxu1 %vm388_vm0, %v361_v29 }
  0x69   : > { %1851 = vmatmul.msk.f32.gmra.mxu2 %vm388_vm0, %v361_v29  ;;  %1859 = vmatmul.msk.f32.gmra.mxu3 %vm388_vm0, %v361_v29  ;;  %v3565_v29 = vld [vmem:[#allocation30_spill] sm:$0xff] }
  0x6a   : > { %794 = vmatpush.msra.mxu0 %v2511_v38  ;;  %814 = vmatpush.msra.mxu1 %v2513_v39 }
  0x6b   : > { %834 = vmatpush.msra.mxu2 %v2519_v41  ;;  %854 = vmatpush.msra.mxu3 %v2517_v40 }
  0x6c   : > { %795 = vmatpush.msra.mxu0 %v2527_v43  ;;  %815 = vmatpush.msra.mxu1 %v2529_v44 }
  0x6d   : > { %835 = vmatpush.msra.mxu2 %v2536_v46  ;;  %855 = vmatpush.msra.mxu3 %v2534_v45 }
  0x6e   : > { %796 = vmatpush.msra.mxu0 %v2540_v47  ;;  %816 = vmatpush.msra.mxu1 %v2542_v48 }
  0x6f   : > { %836 = vmatpush.msra.mxu2 %v2548_v50  ;;  %856 = vmatpush.msra.mxu3 %v2546_v49 }
  0x70   : > { %696 = vmatmul.f32.vlgmr.msrb.gmra.mxu0 %v2258_v15  ;;  %716 = vmatmul.f32.vlgmr.msrb.gmra.mxu1 %v2258_v15 }
  0x71   : > { %736 = vmatmul.f32.vlgmr.msrb.gmra.mxu2 %v2258_v15  ;;  %756 = vmatmul.f32.vlgmr.msrb.gmra.mxu3 %v2258_v15  ;;  %v3566_v15 = vld [vmem:[#allocation34_spill] sm:$0xff] }
  0x72   : > { %797 = vmatpush.msra.mxu0 %v2552_v51  ;;  %817 = vmatpush.msra.mxu1 %v2554_v52 }
  0x73   : > { %837 = vmatpush.msra.mxu2 %v2560_v54  ;;  %857 = vmatpush.msra.mxu3 %v2558_v53 }
  0x74   : > { %798 = vmatpush.msra.mxu0 %v2568_v56  ;;  %818 = vmatpush.msra.mxu1 %v2570_v57 }
  0x75   : > { %838 = vmatpush.msra.mxu2 %v2577_v59  ;;  %858 = vmatpush.msra.mxu3 %v2575_v58 }
  0x76   : > { %799 = vmatpush.msra.mxu0 %v2581_v60  ;;  %819 = vmatpush.msra.mxu1 %v2583_v61 }
  0x77   : > { %839 = vmatpush.msra.mxu2 %v2589_v63  ;;  %859 = vmatpush.msra.mxu3 %v2587_v62 }
  0x78   : > { %800 = vmatpush.msra.mxu0 %v2593_v0  ;;  %820 = vmatpush.msra.mxu1 %v2595_v1 }
  0x79   : > { %840 = vmatpush.msra.mxu2 %v2601_v3  ;;  %860 = vmatpush.msra.mxu3 %v2599_v2 }
  0x7a   : > { %801 = vmatpush.msra.mxu0 %v2609_v5  ;;  %821 = vmatpush.msra.mxu1 %v2611_v6 }
  0x7b   : > { %841 = vmatpush.msra.mxu2 %v2618_v8  ;;  %861 = vmatpush.msra.mxu3 %v2616_v7 }
  0x7c   : > { %802 = vmatpush.msra.mxu0 %v2622_v9  ;;  %822 = vmatpush.msra.mxu1 %v2624_v10 }
  0x7d   : > { %842 = vmatpush.msra.mxu2 %v2630_v12  ;;  %862 = vmatpush.msra.mxu3 %v3565_v29 }
  0x7e   : > { %803 = vmatpush.msra.mxu0 %v2634_v13  ;;  %823 = vmatpush.msra.mxu1 %v2636_v14 }
  0x7f   : > { %843 = vmatpush.msra.mxu2 %v2642_v16  ;;  %863 = vmatpush.msra.mxu3 %v3566_v15 }
  0x80   : > { %804 = vmatpush.msra.mxu0 %v2650_v42  ;;  %824 = vmatpush.msra.mxu1 %v2652_v55 }
  0x81   : > { %844 = vmatpush.msra.mxu2 %v2659_v11  ;;  %864 = vmatpush.msra.mxu3 %v2657_v4 }
  0x82   : > { %898 = vmatpush.msrb.mxu0 %v2446_v17  ;;  %918 = vmatpush.msrb.mxu1 %v2448_v18 }
  0x83   : > { %938 = vmatpush.msrb.mxu2 %v2454_v20  ;;  %958 = vmatpush.msrb.mxu3 %v2452_v19 }
  0x84   : > { %899 = vmatpush.msrb.mxu0 %v2458_v21  ;;  %919 = vmatpush.msrb.mxu1 %v2460_v22 }
  0x85   : > { %939 = vmatpush.msrb.mxu2 %v2466_v24  ;;  %959 = vmatpush.msrb.mxu3 %v2464_v23 }
  0x86   : > { %900 = vmatpush.msrb.mxu0 %v2470_v25  ;;  %920 = vmatpush.msrb.mxu1 %v2472_v26 }
  0x87   : > { %940 = vmatpush.msrb.mxu2 %v2478_v28  ;;  %960 = vmatpush.msrb.mxu3 %v2476_v27 }
  0x88   : > { %901 = vmatpush.msrb.mxu0 %v2486_v30  ;;  %921 = vmatpush.msrb.mxu1 %v2488_v31 }
  0x89   : > { %941 = vmatpush.msrb.mxu2 %v2495_v33  ;;  %961 = vmatpush.msrb.mxu3 %v2493_v32 }
  0x8a   : > { %902 = vmatpush.msrb.mxu0 %v2499_v34  ;;  %922 = vmatpush.msrb.mxu1 %v2501_v35 }
  0x8b   : > { %942 = vmatpush.msrb.mxu2 %v2507_v37  ;;  %962 = vmatpush.msrb.mxu3 %v2505_v36 }
  0x8c   : > { %903 = vmatpush.msrb.mxu0 %v2511_v38  ;;  %923 = vmatpush.msrb.mxu1 %v2513_v39 }
  0x8d   : > { %943 = vmatpush.msrb.mxu2 %v2519_v41  ;;  %963 = vmatpush.msrb.mxu3 %v2517_v40 }
  0x8e   : > { %904 = vmatpush.msrb.mxu0 %v2527_v43  ;;  %924 = vmatpush.msrb.mxu1 %v2529_v44 }
  0x8f   : > { %944 = vmatpush.msrb.mxu2 %v2536_v46  ;;  %964 = vmatpush.msrb.mxu3 %v2534_v45 }
  0x90   : > { %905 = vmatpush.msrb.mxu0 %v2540_v47  ;;  %925 = vmatpush.msrb.mxu1 %v2542_v48 }
  0x91   : > { %945 = vmatpush.msrb.mxu2 %v2548_v50  ;;  %965 = vmatpush.msrb.mxu3 %v2546_v49 }
  0x92   : > { %906 = vmatpush.msrb.mxu0 %v2552_v51  ;;  %926 = vmatpush.msrb.mxu1 %v2554_v52 }
  0x93   : > { %946 = vmatpush.msrb.mxu2 %v2560_v54  ;;  %966 = vmatpush.msrb.mxu3 %v2558_v53 }
  0x94   : > { %907 = vmatpush.msrb.mxu0 %v2568_v56  ;;  %927 = vmatpush.msrb.mxu1 %v2570_v57 }
  0x95   : > { %947 = vmatpush.msrb.mxu2 %v2577_v59  ;;  %967 = vmatpush.msrb.mxu3 %v2575_v58 }
  0x96   : > { %908 = vmatpush.msrb.mxu0 %v2581_v60  ;;  %928 = vmatpush.msrb.mxu1 %v2583_v61 }
  0x97   : > { %948 = vmatpush.msrb.mxu2 %v2589_v63  ;;  %968 = vmatpush.msrb.mxu3 %v2587_v62 }
  0x98   : > { %909 = vmatpush.msrb.mxu0 %v2593_v0  ;;  %929 = vmatpush.msrb.mxu1 %v2595_v1 }
  0x99   : > { %949 = vmatpush.msrb.mxu2 %v2601_v3  ;;  %969 = vmatpush.msrb.mxu3 %v2599_v2 }
  0x9a   : > { %910 = vmatpush.msrb.mxu0 %v2609_v5  ;;  %930 = vmatpush.msrb.mxu1 %v2611_v6 }
  0x9b   : > { %950 = vmatpush.msrb.mxu2 %v2618_v8  ;;  %970 = vmatpush.msrb.mxu3 %v2616_v7 }
  0x9c   : > { %911 = vmatpush.msrb.mxu0 %v2622_v9  ;;  %931 = vmatpush.msrb.mxu1 %v2624_v10 }
  0x9d   : > { %951 = vmatpush.msrb.mxu2 %v2630_v12  ;;  %971 = vmatpush.msrb.mxu3 %v3565_v29 }
  0x9e   : > { %912 = vmatpush.msrb.mxu0 %v2634_v13  ;;  %932 = vmatpush.msrb.mxu1 %v2636_v14  ;;  %v378_v13 = vld [vmem:[%s3431_s3] sm:$0xf] }
  0x9f   : > { %952 = vmatpush.msrb.mxu2 %v2642_v16  ;;  %972 = vmatpush.msrb.mxu3 %v3566_v15  ;;  %v380_v29 = vperm.slane %v378_v13, 0  ;;  %v381_v14 = vperm.slane %v378_v13, 1 }
  0xa0   : > { %913 = vmatpush.msrb.mxu0 %v2650_v42  ;;  %933 = vmatpush.msrb.mxu1 %v2652_v55 }
  0xa1   : > { %953 = vmatpush.msrb.mxu2 %v2659_v11  ;;  %973 = vmatpush.msrb.mxu3 %v2657_v4  ;;  %v2816_v11 = vperm.slane %v378_v13, 2  ;;  %v2818_v4 = vperm.slane %v378_v13, 3 }
  0xad   : > { %v430_v10 = vpop.f32.mrf.mxu0  ;;  %v471_v12 = vpop.f32.mrf.mxu1 }
  0xb4   : > { %v2808_v9 = vpop.f32.mrf.mxu2  ;;  %v2810_v16 = vpop.f32.mrf.mxu3 }
  0xb5   : > { %v433_v15 = vpop.f32.mrf.mxu0  ;;  %v474_v42 = vpop.f32.mrf.mxu1 }
  0xb6   : > { %v2812_v7 = vadd.f32 %v433_v15, %v380_v29  ;;  %v2814_v55 = vadd.f32 %v474_v42, %v381_v14 }
  0xb8   : > { %3567 = vst [vmem:[#allocation40_spill] sm:$0xff] %v2812_v7 }
  0xb9   : > { %3568 = vst [vmem:[#allocation41_spill] sm:$0xff] %v2814_v55 }
  0xbc   : > { %v515_v8 = vpop.f32.mrf.mxu2  ;;  %v556_v6 = vpop.f32.mrf.mxu3 }
  0xbd   : > { %v2821_v5 = vadd.f32 %v515_v8, %v2816_v11  ;;  %v2824_v2 = vadd.f32 %v556_v6, %v2818_v4  ;;  %v436_v3 = vpop.f32.mrf.mxu0  ;;  %v477_v1 = vpop.f32.mrf.mxu1 }
  0xbe   : > { %v2826_v0 = vadd.f32 %v436_v3, %v380_v29  ;;  %v2828_v15 = vadd.f32 %v477_v1, %v381_v14 }
  0xbf   : > { %3569 = vst [vmem:[#allocation42_spill] sm:$0xff] %v2821_v5 }
  0xc0   : > { %3570 = vst [vmem:[#allocation43_spill] sm:$0xff] %v2824_v2 }
  0xc1   : > { %3571 = vst [vmem:[#allocation44_spill] sm:$0xff] %v2826_v0 }
  0xc2   : > { %3572 = vst [vmem:[#allocation45_spill] sm:$0xff] %v2828_v15 }
  0xc4   : > { %v518_v42 = vpop.f32.mrf.mxu2  ;;  %v559_v55 = vpop.f32.mrf.mxu3 }
  0xc5   : > { %v2831_v7 = vadd.f32 %v518_v42, %v2816_v11  ;;  %v2834_v13 = vadd.f32 %v559_v55, %v2818_v4  ;;  %v439_v62 = vpop.f32.mrf.mxu0  ;;  %v480_v8 = vpop.f32.mrf.mxu1 }
  0xc6   : > { %v2836_v5 = vadd.f32 %v439_v62, %v380_v29  ;;  %v2838_v6 = vadd.f32 %v480_v8, %v381_v14 }
  0xc7   : > { %3573 = vst [vmem:[#allocation46_spill] sm:$0xff] %v2831_v7 }
  0xc8   : > { %3574 = vst [vmem:[#allocation47_spill] sm:$0xff] %v2834_v13 }
  0xc9   : > { %3575 = vst [vmem:[#allocation48_spill] sm:$0xff] %v2836_v5 }
  0xca   : > { %3576 = vst [vmem:[#allocation49_spill] sm:$0xff] %v2838_v6 }
  0xcc   : > { %v521_v2 = vpop.f32.mrf.mxu2  ;;  %v562_v63 = vpop.f32.mrf.mxu3 }
  0xcd   : > { %v2841_v3 = vadd.f32 %v521_v2, %v2816_v11  ;;  %v2844_v1 = vadd.f32 %v562_v63, %v2818_v4  ;;  %v442_v15 = vpop.f32.mrf.mxu0  ;;  %v483_v42 = vpop.f32.mrf.mxu1 }
  0xce   : > { %v2846_v7 = vadd.f32 %v442_v15, %v380_v29  ;;  %v2848_v55 = vadd.f32 %v483_v42, %v381_v14 }
  0xcf   : > { %3577 = vst [vmem:[#allocation50_spill] sm:$0xff] %v2841_v3 }
  0xd0   : > { %3578 = vst [vmem:[#allocation51_spill] sm:$0xff] %v2844_v1 }
  0xd1   : > { %3579 = vst [vmem:[#allocation52_spill] sm:$0xff] %v2846_v7 }
  0xd2   : > { %3580 = vst [vmem:[#allocation53_spill] sm:$0xff] %v2848_v55 }
  0xd4   : > { %v524_v13 = vpop.f32.mrf.mxu2  ;;  %v565_v0 = vpop.f32.mrf.mxu3 }
  0xd5   : > { %v2851_v62 = vadd.f32 %v524_v13, %v2816_v11  ;;  %v2854_v8 = vadd.f32 %v565_v0, %v2818_v4  ;;  %v445_v6 = vpop.f32.mrf.mxu0  ;;  %v486_v2 = vpop.f32.mrf.mxu1 }
  0xd6   : > { %v2856_v3 = vadd.f32 %v445_v6, %v380_v29  ;;  %v2858_v63 = vadd.f32 %v486_v2, %v381_v14 }
  0xd7   : > { %3581 = vst [vmem:[#allocation54_spill] sm:$0xff] %v2851_v62 }
  0xd8   : > { %3582 = vst [vmem:[#allocation55_spill] sm:$0xff] %v2854_v8 }
  0xd9   : > { %3583 = vst [vmem:[#allocation56_spill] sm:$0xff] %v2856_v3  ;;  %v472_v3 = vadd.f32 %v471_v12, %v381_v14 }
  0xda   : > { %3584 = vst [vmem:[#allocation57_spill] sm:$0xff] %v2858_v63 }
  0xdc   : > { %v527_v1 = vpop.f32.mrf.mxu2  ;;  %v568_v5 = vpop.f32.mrf.mxu3 }
  0xdd   : > { %v2861_v15 = vadd.f32 %v527_v1, %v2816_v11  ;;  %v2864_v42 = vadd.f32 %v568_v5, %v2818_v4  ;;  %v448_v55 = vpop.f32.mrf.mxu0  ;;  %v489_v13 = vpop.f32.mrf.mxu1 }
  0xde   : > { %v2866_v62 = vadd.f32 %v448_v55, %v380_v29  ;;  %v2868_v0 = vadd.f32 %v489_v13, %v381_v14 }
  0xdf   : > { %3585 = vst [vmem:[#allocation58_spill] sm:$0xff] %v2861_v15 }
  0xe0   : > { %3586 = vst [vmem:[#allocation59_spill] sm:$0xff] %v2864_v42  ;;  %v431_v42 = vadd.f32 %v430_v10, %v380_v29  ;;  %v554_v10 = vadd.f32 %v2810_v16, %v2818_v4 }
  0xe1   : > { %3587 = vst [vmem:[#allocation60_spill] sm:$0xff] %v2866_v62 }
  0xe2   : > { %3588 = vst [vmem:[#allocation61_spill] sm:$0xff] %v2868_v0 }
  0xe4   : > { %v530_v8 = vpop.f32.mrf.mxu2  ;;  %v571_v7 = vpop.f32.mrf.mxu3 }
  0xe5   : > { %v2871_v6 = vadd.f32 %v530_v8, %v2816_v11  ;;  %v2874_v2 = vadd.f32 %v571_v7, %v2818_v4  ;;  %v451_v63 = vpop.f32.mrf.mxu0  ;;  %v492_v1 = vpop.f32.mrf.mxu1 }
  0xe6   : > { %v2876_v15 = vadd.f32 %v451_v63, %v380_v29  ;;  %v2878_v5 = vadd.f32 %v492_v1, %v381_v14  ;;  %v513_v63 = vadd.f32 %v2808_v9, %v2816_v11 }
  0xe7   : > { %3589 = vst [vmem:[#allocation62_spill] sm:$0xff] %v2871_v6 }
  0xe8   : > { %3590 = vst [vmem:[#allocation63_spill] sm:$0xff] %v2874_v2 }
  0xe9   : > { %3591 = vst [vmem:[#allocation64_spill] sm:$0xff] %v2876_v15  ;;  %v3617_v15 = vld [vmem:[#allocation39_spill] sm:$0xff] }
  0xea   : > { %3592 = vst [vmem:[#allocation65_spill] sm:$0xff] %v2878_v5  ;;  %v3616_v5 = vld [vmem:[#allocation37_spill] sm:$0xff] }
  0xec   : > { %v533_v55 = vpop.f32.mrf.mxu2  ;;  %v574_v62 = vpop.f32.mrf.mxu3 }
  0xed   : > { %v2881_v13 = vadd.f32 %v533_v55, %v2816_v11  ;;  %v2884_v0 = vadd.f32 %v574_v62, %v2818_v4  ;;  %v697_v8 = vpop.f32.mrf.mxu0  ;;  %v717_v6 = vpop.f32.mrf.mxu1 }
  0xee   : > { %v760_v7 = vadd.f32 %v697_v8, %v431_v42  ;;  %v761_v2 = vadd.f32 %v717_v6, %v472_v3 }
  0xef   : > { %3593 = vst [vmem:[#allocation66_spill] sm:$0xff] %v2881_v13  ;;  %v3615_v13 = vld [vmem:[#allocation36_spill] sm:$0xff] }
  0xf0   : > { %3594 = vst [vmem:[#allocation67_spill] sm:$0xff] %v2884_v0  ;;  %v764_v61 = vmul.f32 0.5, %v760_v7  ;;  %v765_v60 = vmul.f32 0.5, %v761_v2 }
  0xf2   : > { %1943 = vtanh.f32 %v764_v61 }
  0xf3   : > { %1945 = vtanh.f32 %v765_v60 }
  0xf4   : > { %v737_v12 = vpop.f32.mrf.mxu2  ;;  %v757_v14 = vpop.f32.mrf.mxu3 }
  0xf5   : > { %v762_v29 = vadd.f32 %v737_v12, %v513_v63  ;;  %v763_v1 = vadd.f32 %v757_v14, %v554_v10  ;;  %v3596_v10 = vld [vmem:[#allocation17_spill] sm:$0xff]  ;;  %v3597_v12 = vld [vmem:[#allocation19_spill] sm:$0xff]  ;;  %v3598_v14 = vld [vmem:[#allocation18_spill] sm:$0xff] }
  0xf7   : > { %v766_v62 = vmul.f32 0.5, %v762_v29  ;;  %1947 = vtanh.f32 %v763_v1  ;;  %v3599_v29 = vld [vmem:[#allocation20_spill] sm:$0xff]  ;;  %v3600_v1 = vld [vmem:[#allocation21_spill] sm:$0xff] }
  0xf8   : > { %v1944_v55 = vpop.eup %1943 }
  0xf9   : > { %v1946_v0 = vpop.eup %1945  ;;  %v770_v42 = vadd.f32 1.0, %v1944_v55  ;;  %1949 = vtanh.f32 %v766_v62  ;;  %v3601_v62 = vld [vmem:[#allocation23_spill] sm:$0xff]  ;;  %v3602_v55 = vld [vmem:[#allocation22_spill] sm:$0xff] }
  0xfa   : > { %v771_v3 = vadd.f32 1.0, %v1946_v0  ;;  %v3595_v0 = vld [vmem:[#allocation16_spill] sm:$0xff] }
  0xfb   : > { %v773_v6 = vmul.f32 0.5, %v770_v42  ;;  %v3603_v42 = vld [vmem:[#allocation24_spill] sm:$0xff] }
  0xfc   : > { %v774_v61 = vmul.f32 0.5, %v771_v3  ;;  %v3604_v3 = vld [vmem:[#allocation25_spill] sm:$0xff] }
  0xfd   : > { %v1948_v2 = vpop.eup %1947 }
  0xfe   : > { %v777_v8 = vmul.f32 0.0, %v774_v61  ;;  %v778_v9 = vmul.f32 %v1948_v2, %v773_v6  ;;  %v3605_v6 = vld [vmem:[#allocation27_spill] sm:$0xff]  ;;  %v3606_v61 = vld [vmem:[#allocation26_spill] sm:$0xff]  ;;  %v3607_v2 = vld [vmem:[#allocation28_spill] sm:$0xff] }
  0xff   : > { %v1950_v11 = vpop.eup %1949 }
 0x100   : > { %v2890_v7 = vadd.f32 %v778_v9, %v777_v8  ;;  %v772_v60 = vadd.f32 1.0, %v1950_v11  ;;  %v3608_v8 = vld [vmem:[#allocation29_spill] sm:$0xff]  ;;  %v3609_v9 = vld [vmem:[#allocation31_spill] sm:$0xff]  ;;  %v3610_v11 = vld [vmem:[#allocation30_spill] sm:$0xff] }
 0x102   : > { %1951 = vtanh.f32 %v2890_v7  ;;  %v775_v16 = vmul.f32 0.5, %v772_v60  ;;  %v3611_v60 = vld [vmem:[#allocation32_spill] sm:$0xff] }
 0x108   : > { %v1952_v4 = vpop.eup %1951 }
 0x109   : > { %v781_v63 = vmul.f32 %v1952_v4, %v775_v16  ;;  %v3612_v16 = vld [vmem:[#allocation33_spill] sm:$0xff]  ;;  %v3613_v4 = vld [vmem:[#allocation35_spill] sm:$0xff] }
 0x10b   : > { %805 = vmatmul.f32.vlgmr.msra.gmra.mxu0 %v781_v63  ;;  %825 = vmatmul.f32.vlgmr.msra.gmra.mxu1 %v781_v63 }
 0x10c   : > { %845 = vmatmul.f32.vlgmr.msra.gmra.mxu2 %v781_v63  ;;  %865 = vmatmul.f32.vlgmr.msra.gmra.mxu3 %v781_v63  ;;  %v3614_v63 = vld [vmem:[#allocation34_spill] sm:$0xff] }
 0x10d   : > { %1007 = vmatpush.msra.mxu0 %v2446_v17  ;;  %1027 = vmatpush.msra.mxu1 %v2448_v18 }
 0x10e   : > { %1047 = vmatpush.msra.mxu2 %v2454_v20  ;;  %1067 = vmatpush.msra.mxu3 %v2452_v19 }
 0x10f   : > { %1008 = vmatpush.msra.mxu0 %v2458_v21  ;;  %1028 = vmatpush.msra.mxu1 %v2460_v22 }
 0x110   : > { %1048 = vmatpush.msra.mxu2 %v2466_v24  ;;  %1068 = vmatpush.msra.mxu3 %v2464_v23 }
 0x111   : > { %1009 = vmatpush.msra.mxu0 %v2470_v25  ;;  %1029 = vmatpush.msra.mxu1 %v2472_v26 }
 0x112   : > { %1049 = vmatpush.msra.mxu2 %v2478_v28  ;;  %1069 = vmatpush.msra.mxu3 %v2476_v27 }
 0x113   : > { %1010 = vmatpush.msra.mxu0 %v2486_v30  ;;  %1030 = vmatpush.msra.mxu1 %v2488_v31 }
 0x114   : > { %1050 = vmatpush.msra.mxu2 %v2495_v33  ;;  %1070 = vmatpush.msra.mxu3 %v2493_v32 }
 0x115   : > { %1011 = vmatpush.msra.mxu0 %v2499_v34  ;;  %1031 = vmatpush.msra.mxu1 %v2501_v35 }
 0x116   : > { %1051 = vmatpush.msra.mxu2 %v2507_v37  ;;  %1071 = vmatpush.msra.mxu3 %v2505_v36 }
 0x117   : > { %1012 = vmatpush.msra.mxu0 %v2511_v38  ;;  %1032 = vmatpush.msra.mxu1 %v2513_v39 }
 0x118   : > { %1052 = vmatpush.msra.mxu2 %v2519_v41  ;;  %1072 = vmatpush.msra.mxu3 %v2517_v40 }
 0x119   : > { %1013 = vmatpush.msra.mxu0 %v2527_v43  ;;  %1033 = vmatpush.msra.mxu1 %v2529_v44 }
 0x11a   : > { %1053 = vmatpush.msra.mxu2 %v2536_v46  ;;  %1073 = vmatpush.msra.mxu3 %v2534_v45 }
 0x11b   : > { %1014 = vmatpush.msra.mxu0 %v2540_v47  ;;  %1034 = vmatpush.msra.mxu1 %v2542_v48 }
 0x11c   : > { %1054 = vmatpush.msra.mxu2 %v2548_v50  ;;  %1074 = vmatpush.msra.mxu3 %v2546_v49 }
 0x11d   : > { %1015 = vmatpush.msra.mxu0 %v2552_v51  ;;  %1035 = vmatpush.msra.mxu1 %v2554_v52 }
 0x11e   : > { %1055 = vmatpush.msra.mxu2 %v2560_v54  ;;  %1075 = vmatpush.msra.mxu3 %v2558_v53 }
 0x11f   : > { %1016 = vmatpush.msra.mxu0 %v2568_v56  ;;  %1036 = vmatpush.msra.mxu1 %v2570_v57 }
 0x120   : > { %1056 = vmatpush.msra.mxu2 %v2577_v59  ;;  %1076 = vmatpush.msra.mxu3 %v2575_v58 }
 0x121   : > { %1017 = vmatpush.msra.mxu0 %v3595_v0  ;;  %1037 = vmatpush.msra.mxu1 %v3596_v10 }
 0x122   : > { %1057 = vmatpush.msra.mxu2 %v3597_v12  ;;  %1077 = vmatpush.msra.mxu3 %v3598_v14 }
 0x123   : > { %1018 = vmatpush.msra.mxu0 %v3599_v29  ;;  %1038 = vmatpush.msra.mxu1 %v3600_v1 }
 0x124   : > { %1058 = vmatpush.msra.mxu2 %v3601_v62  ;;  %1078 = vmatpush.msra.mxu3 %v3602_v55  ;;  %v3622_v55 = vld [vmem:[#allocation43_spill] sm:$0xff] }
 0x125   : > { %1019 = vmatpush.msra.mxu0 %v3603_v42  ;;  %1039 = vmatpush.msra.mxu1 %v3604_v3  ;;  %v3621_v42 = vld [vmem:[#allocation42_spill] sm:$0xff] }
 0x126   : > { %1059 = vmatpush.msra.mxu2 %v3605_v6  ;;  %1079 = vmatpush.msra.mxu3 %v3606_v61  ;;  %v3619_v61 = vld [vmem:[#allocation40_spill] sm:$0xff]  ;;  %v3620_v6 = vld [vmem:[#allocation41_spill] sm:$0xff] }
 0x127   : > { %1020 = vmatpush.msra.mxu0 %v3607_v2  ;;  %1040 = vmatpush.msra.mxu1 %v3608_v8  ;;  %v3618_v2 = vld [vmem:[#allocation38_spill] sm:$0xff] }
 0x128   : > { %1060 = vmatpush.msra.mxu2 %v3609_v9  ;;  %1080 = vmatpush.msra.mxu3 %v3610_v11 }
 0x129   : > { %1021 = vmatpush.msra.mxu0 %v3611_v60  ;;  %1041 = vmatpush.msra.mxu1 %v3612_v16 }
 0x12a   : > { %1061 = vmatpush.msra.mxu2 %v3613_v4  ;;  %1081 = vmatpush.msra.mxu3 %v3614_v63 }
 0x12b   : > { %1022 = vmatpush.msra.mxu0 %v3615_v13  ;;  %1042 = vmatpush.msra.mxu1 %v3616_v5 }
 0x12c   : > { %1062 = vmatpush.msra.mxu2 %v3617_v15  ;;  %1082 = vmatpush.msra.mxu3 %v3618_v2 }
 0x188   : > { %v806_v8 = vpop.f32.mrf.mxu0  ;;  %v826_v9 = vpop.f32.mrf.mxu1 }
 0x189   : > { %v869_v11 = vadd.f32 %v806_v8, %v3619_v61  ;;  %v870_v60 = vadd.f32 %v826_v9, %v3620_v6 }
 0x18b   : > { %v873_v3 = vmul.f32 0.5, %v869_v11  ;;  %v874_v16 = vmul.f32 0.5, %v870_v60 }
 0x18d   : > { %1953 = vtanh.f32 %v873_v3 }
 0x18e   : > { %1955 = vtanh.f32 %v874_v16  ;;  %v3037_v16 = vld [vmem:[#allocation3 + $0x1e0] sm:$0xff] }
 0x18f   : > { %v846_v4 = vpop.f32.mrf.mxu2  ;;  %v866_v63 = vpop.f32.mrf.mxu3 }
 0x190   : > { %v871_v13 = vadd.f32 %v846_v4, %v3621_v42  ;;  %v872_v5 = vadd.f32 %v866_v63, %v3622_v55  ;;  %v3040_v4 = vld [vmem:[#allocation3 + $0x1e8] sm:$0xff]  ;;  %v3043_v63 = vld [vmem:[#allocation3 + $0x1f0] sm:$0xff] }
 0x192   : > { %v875_v62 = vmul.f32 0.5, %v871_v13  ;;  %1957 = vtanh.f32 %v872_v5 }
 0x193   : > { %v1954_v15 = vpop.eup %1953 }
 0x194   : > { %v1956_v2 = vpop.eup %1955  ;;  %v879_v1 = vadd.f32 1.0, %v1954_v15  ;;  %1959 = vtanh.f32 %v875_v62 }
 0x195   : > { %v880_v29 = vadd.f32 1.0, %v1956_v2 }
 0x196   : > { %v882_v61 = vmul.f32 0.5, %v879_v1 }
 0x197   : > { %v883_v8 = vmul.f32 0.5, %v880_v29 }
 0x198   : > { %v1958_v6 = vpop.eup %1957 }
 0x199   : > { %v886_v9 = vmul.f32 %v883_v8, %v2890_v7  ;;  %v887_v3 = vmul.f32 %v1958_v6, %v882_v61  ;;  %v3046_v61 = vld [vmem:[#allocation3 + $0x1f8] sm:$0xff]  ;;  %v3049_v8 = vld [vmem:[#allocation3 + $0x1c0] sm:$0xff]  ;;  %v3052_v6 = vld [vmem:[#allocation3 + $0x1c8] sm:$0xff] }
 0x19a   : > { %v1960_v11 = vpop.eup %1959 }
 0x19b   : > { %v2962_v60 = vadd.f32 %v887_v3, %v886_v9  ;;  %v881_v42 = vadd.f32 1.0, %v1960_v11  ;;  %v3055_v9 = vld [vmem:[#allocation3 + $0x1d0] sm:$0xff]  ;;  %v3058_v3 = vld [vmem:[#allocation3 + $0x1d8] sm:$0xff]  ;;  %v3061_v11 = vld [vmem:[#allocation3 + $0x1a0] sm:$0xff] }
 0x19d   : > { %1961 = vtanh.f32 %v2962_v60  ;;  %v884_v55 = vmul.f32 0.5, %v881_v42  ;;  %v3067_v42 = vld [vmem:[#allocation3 + $0x1b0] sm:$0xff] }
 0x1a3   : > { %v1962_v13 = vpop.eup %1961 }
 0x1a4   : > { %v890_v5 = vmul.f32 %v1962_v13, %v884_v55  ;;  %v3070_v55 = vld [vmem:[#allocation3 + $0x1b8] sm:$0xff]  ;;  %v3073_v13 = vld [vmem:[#allocation3 + $0x180] sm:$0xff] }
 0x1a6   : > { %914 = vmatmul.f32.vlgmr.msrb.gmra.mxu0 %v890_v5  ;;  %934 = vmatmul.f32.vlgmr.msrb.gmra.mxu1 %v890_v5 }
 0x1a7   : > { %954 = vmatmul.f32.vlgmr.msrb.gmra.mxu2 %v890_v5  ;;  %974 = vmatmul.f32.vlgmr.msrb.gmra.mxu3 %v890_v5  ;;  %v3076_v5 = vld [vmem:[#allocation3 + $0x188] sm:$0xff] }
 0x1a8   : > { %1116 = vmatpush.msrb.mxu0 %v2446_v17  ;;  %1136 = vmatpush.msrb.mxu1 %v2448_v18  ;;  %v3623_v17 = vld [vmem:[#allocation20_spill] sm:$0xff]  ;;  %v3624_v18 = vld [vmem:[#allocation21_spill] sm:$0xff] }
 0x1a9   : > { %1156 = vmatpush.msrb.mxu2 %v2454_v20  ;;  %1176 = vmatpush.msrb.mxu3 %v2452_v19  ;;  %v3625_v19 = vld [vmem:[#allocation23_spill] sm:$0xff]  ;;  %v3626_v20 = vld [vmem:[#allocation22_spill] sm:$0xff] }
 0x1aa   : > { %1117 = vmatpush.msrb.mxu0 %v2458_v21  ;;  %1137 = vmatpush.msrb.mxu1 %v2460_v22  ;;  %v3627_v21 = vld [vmem:[#allocation24_spill] sm:$0xff]  ;;  %v3628_v22 = vld [vmem:[#allocation25_spill] sm:$0xff] }
 0x1ab   : > { %1157 = vmatpush.msrb.mxu2 %v2466_v24  ;;  %1177 = vmatpush.msrb.mxu3 %v2464_v23  ;;  %v3629_v23 = vld [vmem:[#allocation27_spill] sm:$0xff]  ;;  %v3630_v24 = vld [vmem:[#allocation26_spill] sm:$0xff] }
 0x1ac   : > { %1118 = vmatpush.msrb.mxu0 %v2470_v25  ;;  %1138 = vmatpush.msrb.mxu1 %v2472_v26  ;;  %v3631_v25 = vld [vmem:[#allocation28_spill] sm:$0xff]  ;;  %v3632_v26 = vld [vmem:[#allocation29_spill] sm:$0xff] }
 0x1ad   : > { %1158 = vmatpush.msrb.mxu2 %v2478_v28  ;;  %1178 = vmatpush.msrb.mxu3 %v2476_v27  ;;  %v3633_v27 = vld [vmem:[#allocation31_spill] sm:$0xff]  ;;  %v3634_v28 = vld [vmem:[#allocation30_spill] sm:$0xff] }
 0x1ae   : > { %1119 = vmatpush.msrb.mxu0 %v2486_v30  ;;  %1139 = vmatpush.msrb.mxu1 %v2488_v31  ;;  %v3635_v30 = vld [vmem:[#allocation32_spill] sm:$0xff]  ;;  %v3636_v31 = vld [vmem:[#allocation33_spill] sm:$0xff] }
 0x1af   : > { %1159 = vmatpush.msrb.mxu2 %v2495_v33  ;;  %1179 = vmatpush.msrb.mxu3 %v2493_v32  ;;  %v3637_v32 = vld [vmem:[#allocation35_spill] sm:$0xff]  ;;  %v3638_v33 = vld [vmem:[#allocation34_spill] sm:$0xff] }
 0x1b0   : > { %1120 = vmatpush.msrb.mxu0 %v2499_v34  ;;  %1140 = vmatpush.msrb.mxu1 %v2501_v35  ;;  %v3639_v34 = vld [vmem:[#allocation36_spill] sm:$0xff]  ;;  %v3640_v35 = vld [vmem:[#allocation37_spill] sm:$0xff] }
 0x1b1   : > { %1160 = vmatpush.msrb.mxu2 %v2507_v37  ;;  %1180 = vmatpush.msrb.mxu3 %v2505_v36  ;;  %v3641_v36 = vld [vmem:[#allocation39_spill] sm:$0xff]  ;;  %v3642_v37 = vld [vmem:[#allocation38_spill] sm:$0xff] }
 0x1b2   : > { %1121 = vmatpush.msrb.mxu0 %v2511_v38  ;;  %1141 = vmatpush.msrb.mxu1 %v2513_v39 }
 0x1b3   : > { %1161 = vmatpush.msrb.mxu2 %v2519_v41  ;;  %1181 = vmatpush.msrb.mxu3 %v2517_v40  ;;  %v3643_v40 = vld [vmem:[#allocation44_spill] sm:$0xff] }
 0x1b4   : > { %1122 = vmatpush.msrb.mxu0 %v2527_v43  ;;  %1142 = vmatpush.msrb.mxu1 %v2529_v44  ;;  %v3644_v43 = vld [vmem:[#allocation45_spill] sm:$0xff] }
 0x1b5   : > { %1162 = vmatpush.msrb.mxu2 %v2536_v46  ;;  %1182 = vmatpush.msrb.mxu3 %v2534_v45 }
 0x1b6   : > { %1123 = vmatpush.msrb.mxu0 %v2540_v47  ;;  %1143 = vmatpush.msrb.mxu1 %v2542_v48 }
 0x1b7   : > { %1163 = vmatpush.msrb.mxu2 %v2548_v50  ;;  %1183 = vmatpush.msrb.mxu3 %v2546_v49  ;;  %v3645_v49 = vld [vmem:[#allocation46_spill] sm:$0xff] }
 0x1b8   : > { %1124 = vmatpush.msrb.mxu0 %v2552_v51  ;;  %1144 = vmatpush.msrb.mxu1 %v2554_v52  ;;  %v3646_v51 = vld [vmem:[#allocation47_spill] sm:$0xff] }
 0x1b9   : > { %1164 = vmatpush.msrb.mxu2 %v2560_v54  ;;  %1184 = vmatpush.msrb.mxu3 %v2558_v53 }
 0x1ba   : > { %1125 = vmatpush.msrb.mxu0 %v2568_v56  ;;  %1145 = vmatpush.msrb.mxu1 %v2570_v57 }
 0x1bb   : > { %1165 = vmatpush.msrb.mxu2 %v2577_v59  ;;  %1185 = vmatpush.msrb.mxu3 %v2575_v58 }
 0x1bc   : > { %1126 = vmatpush.msrb.mxu0 %v3595_v0  ;;  %1146 = vmatpush.msrb.mxu1 %v3596_v10 }
 0x1bd   : > { %1166 = vmatpush.msrb.mxu2 %v3597_v12  ;;  %1186 = vmatpush.msrb.mxu3 %v3598_v14 }
 0x1be   : > { %1127 = vmatpush.msrb.mxu0 %v3623_v17  ;;  %1147 = vmatpush.msrb.mxu1 %v3624_v18  ;;  %v3079_v17 = vld [vmem:[#allocation3 + $0x190] sm:$0xff]  ;;  %v3082_v18 = vld [vmem:[#allocation3 + $0x198] sm:$0xff] }
 0x1bf   : > { %1167 = vmatpush.msrb.mxu2 %v3625_v19  ;;  %1187 = vmatpush.msrb.mxu3 %v3626_v20  ;;  %v3085_v19 = vld [vmem:[#allocation3 + $0x160] sm:$0xff]  ;;  %v3088_v20 = vld [vmem:[#allocation3 + $0x168] sm:$0xff] }
 0x1c0   : > { %1128 = vmatpush.msrb.mxu0 %v3627_v21  ;;  %1148 = vmatpush.msrb.mxu1 %v3628_v22  ;;  %v3091_v21 = vld [vmem:[#allocation3 + $0x170] sm:$0xff]  ;;  %v3094_v22 = vld [vmem:[#allocation3 + $0x178] sm:$0xff] }
 0x1c1   : > { %1168 = vmatpush.msrb.mxu2 %v3629_v23  ;;  %1188 = vmatpush.msrb.mxu3 %v3630_v24  ;;  %v3097_v23 = vld [vmem:[#allocation3 + $0x140] sm:$0xff]  ;;  %v3100_v24 = vld [vmem:[#allocation3 + $0x148] sm:$0xff] }
 0x1c2   : > { %1129 = vmatpush.msrb.mxu0 %v3631_v25  ;;  %1149 = vmatpush.msrb.mxu1 %v3632_v26  ;;  %v3103_v25 = vld [vmem:[#allocation3 + $0x150] sm:$0xff]  ;;  %v3106_v26 = vld [vmem:[#allocation3 + $0x158] sm:$0xff] }
 0x1c3   : > { %1169 = vmatpush.msrb.mxu2 %v3633_v27  ;;  %1189 = vmatpush.msrb.mxu3 %v3634_v28  ;;  %v3109_v27 = vld [vmem:[#allocation3 + $0x120] sm:$0xff]  ;;  %v3112_v28 = vld [vmem:[#allocation3 + $0x128] sm:$0xff] }
 0x1c4   : > { %1130 = vmatpush.msrb.mxu0 %v3635_v30  ;;  %1150 = vmatpush.msrb.mxu1 %v3636_v31  ;;  %v3115_v30 = vld [vmem:[#allocation3 + $0x130] sm:$0xff]  ;;  %v3118_v31 = vld [vmem:[#allocation3 + $0x138] sm:$0xff] }
 0x1c5   : > { %1170 = vmatpush.msrb.mxu2 %v3637_v32  ;;  %1190 = vmatpush.msrb.mxu3 %v3638_v33  ;;  %v3121_v32 = vld [vmem:[#allocation3 + $0x100] sm:$0xff]  ;;  %v3124_v33 = vld [vmem:[#allocation3 + $0x108] sm:$0xff] }
 0x1c6   : > { %1131 = vmatpush.msrb.mxu0 %v3639_v34  ;;  %1151 = vmatpush.msrb.mxu1 %v3640_v35  ;;  %v3127_v34 = vld [vmem:[#allocation3 + $0x110] sm:$0xff]  ;;  %v3130_v35 = vld [vmem:[#allocation3 + $0x118] sm:$0xff] }
 0x1c7   : > { %1171 = vmatpush.msrb.mxu2 %v3641_v36  ;;  %1191 = vmatpush.msrb.mxu3 %v3642_v37  ;;  %v3133_v36 = vld [vmem:[#allocation3 + $0xe0] sm:$0xff]  ;;  %v3136_v37 = vld [vmem:[#allocation3 + $0xe8] sm:$0xff] }
 0x223   : > { %v915_v38 = vpop.f32.mrf.mxu0  ;;  %v935_v39 = vpop.f32.mrf.mxu1 }
 0x224   : > { %v978_v41 = vadd.f32 %v915_v38, %v3643_v40  ;;  %v979_v44 = vadd.f32 %v935_v39, %v3644_v43  ;;  %v3139_v38 = vld [vmem:[#allocation3 + $0xf0] sm:$0xff]  ;;  %v3142_v39 = vld [vmem:[#allocation3 + $0xf8] sm:$0xff]  ;;  %v3145_v40 = vld [vmem:[#allocation3 + $0xc0] sm:$0xff] }
 0x225   : > { %v3151_v43 = vld [vmem:[#allocation3 + $0xd0] sm:$0xff] }
 0x226   : > { %v982_v45 = vmul.f32 0.5, %v978_v41  ;;  %v983_v46 = vmul.f32 0.5, %v979_v44  ;;  %v3148_v41 = vld [vmem:[#allocation3 + $0xc8] sm:$0xff]  ;;  %v3154_v44 = vld [vmem:[#allocation3 + $0xd8] sm:$0xff] }
 0x228   : > { %1963 = vtanh.f32 %v982_v45  ;;  %v3157_v45 = vld [vmem:[#allocation3 + $0xa0] sm:$0xff] }
 0x229   : > { %1965 = vtanh.f32 %v983_v46  ;;  %v3160_v46 = vld [vmem:[#allocation3 + $0xa8] sm:$0xff] }
 0x22a   : > { %v955_v47 = vpop.f32.mrf.mxu2  ;;  %v975_v48 = vpop.f32.mrf.mxu3 }
 0x22b   : > { %v980_v50 = vadd.f32 %v955_v47, %v3645_v49  ;;  %v981_v52 = vadd.f32 %v975_v48, %v3646_v51  ;;  %v3163_v47 = vld [vmem:[#allocation3 + $0xb0] sm:$0xff]  ;;  %v3166_v48 = vld [vmem:[#allocation3 + $0xb8] sm:$0xff]  ;;  %v3169_v49 = vld [vmem:[#allocation3 + $0x80] sm:$0xff] }
 0x22c   : > { %3647 = vst [vmem:[#allocation16_spill] sm:$0xff] %v3169_v49  ;;  %v3175_v51 = vld [vmem:[#allocation3 + $0x90] sm:$0xff] }
 0x22d   : > { %v984_v53 = vmul.f32 0.5, %v980_v50  ;;  %1967 = vtanh.f32 %v981_v52  ;;  %v3172_v50 = vld [vmem:[#allocation3 + $0x88] sm:$0xff]  ;;  %3649 = vst [vmem:[#allocation19_spill] sm:$0xff] %v3175_v51  ;;  %v3178_v52 = vld [vmem:[#allocation3 + $0x98] sm:$0xff] }
 0x22e   : > { %v1964_v54 = vpop.eup %1963  ;;  %3648 = vst [vmem:[#allocation17_spill] sm:$0xff] %v3172_v50 }
 0x22f   : > { %v1966_v56 = vpop.eup %1965  ;;  %v988_v57 = vadd.f32 1.0, %v1964_v54  ;;  %1969 = vtanh.f32 %v984_v53  ;;  %3650 = vst [vmem:[#allocation18_spill] sm:$0xff] %v3178_v52  ;;  %v3181_v53 = vld [vmem:[#allocation3 + $0x60] sm:$0xff]  ;;  %v3184_v54 = vld [vmem:[#allocation3 + $0x68] sm:$0xff] }
 0x230   : > { %v989_v58 = vadd.f32 1.0, %v1966_v56  ;;  %3651 = vst [vmem:[#allocation40_spill] sm:$0xff] %v3181_v53  ;;  %v3187_v56 = vld [vmem:[#allocation3 + $0x70] sm:$0xff] }
 0x231   : > { %v991_v59 = vmul.f32 0.5, %v988_v57  ;;  %3652 = vst [vmem:[#allocation41_spill] sm:$0xff] %v3184_v54  ;;  %v3190_v57 = vld [vmem:[#allocation3 + $0x78] sm:$0xff] }
 0x232   : > { %v992_v15 = vmul.f32 0.5, %v989_v58  ;;  %3653 = vst [vmem:[#allocation42_spill] sm:$0xff] %v3187_v56  ;;  %v3193_v58 = vld [vmem:[#allocation3 + $0x40] sm:$0xff] }
 0x233   : > { %v1968_v7 = vpop.eup %1967  ;;  %3654 = vst [vmem:[#allocation43_spill] sm:$0xff] %v3190_v57 }
 0x234   : > { %v995_v0 = vmul.f32 %v992_v15, %v2962_v60  ;;  %v996_v10 = vmul.f32 %v1968_v7, %v991_v59  ;;  %v3064_v60 = vld [vmem:[#allocation3 + $0x1a8] sm:$0xff]  ;;  %3655 = vst [vmem:[#allocation20_spill] sm:$0xff] %v3193_v58  ;;  %v3199_v15 = vld [vmem:[#allocation3 + $0x50] sm:$0xff]  ;;  %v3202_v7 = vld [vmem:[#allocation3 + $0x58] sm:$0xff] }
 0x235   : > { %v1970_v12 = vpop.eup %1969  ;;  %v3196_v59 = vld [vmem:[#allocation3 + $0x48] sm:$0xff]  ;;  %3657 = vst [vmem:[#allocation23_spill] sm:$0xff] %v3199_v15 }
 0x236   : > { %v3034_v14 = vadd.f32 %v996_v10, %v995_v0  ;;  %v990_v29 = vadd.f32 1.0, %v1970_v12  ;;  %3656 = vst [vmem:[#allocation21_spill] sm:$0xff] %v3196_v59  ;;  %v3205_v0 = vld [vmem:[#allocation3 + $0x20] sm:$0xff]  ;;  %v3208_v10 = vld [vmem:[#allocation3 + $0x28] sm:$0xff]  ;;  %v3211_v12 = vld [vmem:[#allocation3 + $0x30] sm:$0xff] }
 0x237   : > { %3658 = vst [vmem:[#allocation22_spill] sm:$0xff] %v3202_v7 }
 0x238   : > { %1971 = vtanh.f32 %v3034_v14  ;;  %v993_v1 = vmul.f32 0.5, %v990_v29  ;;  %3659 = vst [vmem:[#allocation24_spill] sm:$0xff] %v3205_v0  ;;  %v3214_v29 = vld [vmem:[#allocation3 + $0x38] sm:$0xff] }
 0x239   : > { %3660 = vst [vmem:[#allocation25_spill] sm:$0xff] %v3208_v10 }
 0x23a   : > { %3661 = vst [vmem:[#allocation27_spill] sm:$0xff] %v3211_v12 }
 0x23b   : > { %3662 = vst [vmem:[#allocation26_spill] sm:$0xff] %v3214_v29 }
 0x23e   : > { %v1972_v62 = vpop.eup %1971 }
 0x23f   : > { %v999_v2 = vmul.f32 %v1972_v62, %v993_v1  ;;  %v3217_v1 = vld [vmem:[#allocation3] sm:$0xff]  ;;  %v3220_v62 = vld [vmem:[#allocation3 + $0x8] sm:$0xff] }
 0x240   : > { %3663 = vst [vmem:[#allocation28_spill] sm:$0xff] %v3217_v1 }
 0x241   : > { %1023 = vmatmul.f32.vlgmr.msra.gmra.mxu0 %v999_v2  ;;  %1043 = vmatmul.f32.vlgmr.msra.gmra.mxu1 %v999_v2  ;;  %3664 = vst [vmem:[#allocation29_spill] sm:$0xff] %v3220_v62 }
 0x242   : > { %1063 = vmatmul.f32.vlgmr.msra.gmra.mxu2 %v999_v2  ;;  %1083 = vmatmul.f32.vlgmr.msra.gmra.mxu3 %v999_v2  ;;  %v3223_v2 = vld [vmem:[#allocation3 + $0x10] sm:$0xff] }
 0x243   : > { %1225 = vmatpush.msra.mxu0 %v3037_v16  ;;  %1245 = vmatpush.msra.mxu1 %v3040_v4  ;;  %3665 = vst [vmem:[#allocation31_spill] sm:$0xff] %v3223_v2 }
 0x244   : > { %1265 = vmatpush.msra.mxu2 %v3043_v63  ;;  %1285 = vmatpush.msra.mxu3 %v3046_v61 }
 0x245   : > { %1226 = vmatpush.msra.mxu0 %v3049_v8  ;;  %1246 = vmatpush.msra.mxu1 %v3052_v6 }
 0x246   : > { %1266 = vmatpush.msra.mxu2 %v3055_v9  ;;  %1286 = vmatpush.msra.mxu3 %v3058_v3 }
 0x247   : > { %1227 = vmatpush.msra.mxu0 %v3061_v11  ;;  %1247 = vmatpush.msra.mxu1 %v3064_v60 }
 0x248   : > { %1267 = vmatpush.msra.mxu2 %v3067_v42  ;;  %1287 = vmatpush.msra.mxu3 %v3070_v55 }
 0x249   : > { %1228 = vmatpush.msra.mxu0 %v3073_v13  ;;  %1248 = vmatpush.msra.mxu1 %v3076_v5 }
 0x24a   : > { %1268 = vmatpush.msra.mxu2 %v3079_v17  ;;  %1288 = vmatpush.msra.mxu3 %v3082_v18 }
 0x24b   : > { %1229 = vmatpush.msra.mxu0 %v3085_v19  ;;  %1249 = vmatpush.msra.mxu1 %v3088_v20 }
 0x24c   : > { %1269 = vmatpush.msra.mxu2 %v3091_v21  ;;  %1289 = vmatpush.msra.mxu3 %v3094_v22 }
 0x24d   : > { %1230 = vmatpush.msra.mxu0 %v3097_v23  ;;  %1250 = vmatpush.msra.mxu1 %v3100_v24 }
 0x24e   : > { %1270 = vmatpush.msra.mxu2 %v3103_v25  ;;  %1290 = vmatpush.msra.mxu3 %v3106_v26 }
 0x24f   : > { %1231 = vmatpush.msra.mxu0 %v3109_v27  ;;  %1251 = vmatpush.msra.mxu1 %v3112_v28 }
 0x250   : > { %1271 = vmatpush.msra.mxu2 %v3115_v30  ;;  %1291 = vmatpush.msra.mxu3 %v3118_v31 }
 0x251   : > { %1232 = vmatpush.msra.mxu0 %v3121_v32  ;;  %1252 = vmatpush.msra.mxu1 %v3124_v33 }
 0x252   : > { %1272 = vmatpush.msra.mxu2 %v3127_v34  ;;  %1292 = vmatpush.msra.mxu3 %v3130_v35 }
 0x253   : > { %1233 = vmatpush.msra.mxu0 %v3133_v36  ;;  %1253 = vmatpush.msra.mxu1 %v3136_v37 }
 0x254   : > { %1273 = vmatpush.msra.mxu2 %v3139_v38  ;;  %1293 = vmatpush.msra.mxu3 %v3142_v39 }
 0x255   : > { %1234 = vmatpush.msra.mxu0 %v3145_v40  ;;  %1254 = vmatpush.msra.mxu1 %v3148_v41 }
 0x256   : > { %1274 = vmatpush.msra.mxu2 %v3151_v43  ;;  %1294 = vmatpush.msra.mxu3 %v3154_v44 }
 0x257   : > { %1235 = vmatpush.msra.mxu0 %v3157_v45  ;;  %1255 = vmatpush.msra.mxu1 %v3160_v46 }
 0x258   : > { %1275 = vmatpush.msra.mxu2 %v3163_v47  ;;  %1295 = vmatpush.msra.mxu3 %v3166_v48 }
 0x259   : > { %1236 = vmatpush.msra.mxu0 %v3169_v49  ;;  %1256 = vmatpush.msra.mxu1 %v3172_v50 }
 0x25a   : > { %1276 = vmatpush.msra.mxu2 %v3175_v51  ;;  %1296 = vmatpush.msra.mxu3 %v3178_v52 }
 0x25b   : > { %1237 = vmatpush.msra.mxu0 %v3181_v53  ;;  %1257 = vmatpush.msra.mxu1 %v3184_v54  ;;  %v3670_v53 = vld [vmem:[#allocation51_spill] sm:$0xff] }
 0x25c   : > { %1277 = vmatpush.msra.mxu2 %v3187_v56  ;;  %1297 = vmatpush.msra.mxu3 %v3190_v57  ;;  %v3669_v56 = vld [vmem:[#allocation50_spill] sm:$0xff] }
 0x25d   : > { %1238 = vmatpush.msra.mxu0 %v3193_v58  ;;  %1258 = vmatpush.msra.mxu1 %v3196_v59 }
 0x25e   : > { %1278 = vmatpush.msra.mxu2 %v3199_v15  ;;  %1298 = vmatpush.msra.mxu3 %v3202_v7  ;;  %v3667_v7 = vld [vmem:[#allocation48_spill] sm:$0xff]  ;;  %v3668_v15 = vld [vmem:[#allocation49_spill] sm:$0xff] }
 0x25f   : > { %1239 = vmatpush.msra.mxu0 %v3205_v0  ;;  %1259 = vmatpush.msra.mxu1 %v3208_v10  ;;  %v3226_v10 = vld [vmem:[#allocation3 + $0x18] sm:$0xff] }
 0x260   : > { %1279 = vmatpush.msra.mxu2 %v3211_v12  ;;  %1299 = vmatpush.msra.mxu3 %v3214_v29  ;;  %3666 = vst [vmem:[#allocation30_spill] sm:$0xff] %v3226_v10 }
 0x261   : > { %1240 = vmatpush.msra.mxu0 %v3217_v1  ;;  %1260 = vmatpush.msra.mxu1 %v3220_v62 }
 0x262   : > { %1280 = vmatpush.msra.mxu2 %v3223_v2  ;;  %1300 = vmatpush.msra.mxu3 %v3226_v10 }
 0x2be   : > { %v1024_v12 = vpop.f32.mrf.mxu0  ;;  %v1044_v0 = vpop.f32.mrf.mxu1 }
 0x2bf   : > { %v1087_v29 = vadd.f32 %v1024_v12, %v3667_v7  ;;  %v1088_v59 = vadd.f32 %v1044_v0, %v3668_v15 }
 0x2c1   : > { %v1091_v58 = vmul.f32 0.5, %v1087_v29  ;;  %v1092_v1 = vmul.f32 0.5, %v1088_v59 }
 0x2c3   : > { %1973 = vtanh.f32 %v1091_v58 }
 0x2c4   : > { %1975 = vtanh.f32 %v1092_v1  ;;  %v3677_v1 = vld [vmem:[#allocation42_spill] sm:$0xff] }
 0x2c5   : > { %v1064_v57 = vpop.f32.mrf.mxu2  ;;  %v1084_v62 = vpop.f32.mrf.mxu3 }
 0x2c6   : > { %v1089_v54 = vadd.f32 %v1064_v57, %v3669_v56  ;;  %v1090_v2 = vadd.f32 %v1084_v62, %v3670_v53  ;;  %v3678_v62 = vld [vmem:[#allocation43_spill] sm:$0xff] }
 0x2c8   : > { %v1093_v52 = vmul.f32 0.5, %v1089_v54  ;;  %1977 = vtanh.f32 %v1090_v2  ;;  %v3679_v2 = vld [vmem:[#allocation20_spill] sm:$0xff] }
 0x2c9   : > { %v1974_v51 = vpop.eup %1973 }
 0x2ca   : > { %v1976_v10 = vpop.eup %1975  ;;  %v1097_v50 = vadd.f32 1.0, %v1974_v51  ;;  %1979 = vtanh.f32 %v1093_v52  ;;  %v3674_v51 = vld [vmem:[#allocation18_spill] sm:$0xff]  ;;  %v3675_v52 = vld [vmem:[#allocation40_spill] sm:$0xff] }
 0x2cb   : > { %v1098_v49 = vadd.f32 1.0, %v1976_v10  ;;  %v3676_v10 = vld [vmem:[#allocation41_spill] sm:$0xff] }
 0x2cc   : > { %v1100_v7 = vmul.f32 0.5, %v1097_v50  ;;  %v3673_v50 = vld [vmem:[#allocation19_spill] sm:$0xff] }
 0x2cd   : > { %v1101_v12 = vmul.f32 0.5, %v1098_v49  ;;  %v3672_v49 = vld [vmem:[#allocation17_spill] sm:$0xff] }
 0x2ce   : > { %v1978_v15 = vpop.eup %1977 }
 0x2cf   : > { %v1104_v59 = vmul.f32 %v1101_v12, %v3034_v14  ;;  %v1105_v58 = vmul.f32 %v1978_v15, %v1100_v7  ;;  %v3671_v14 = vld [vmem:[#allocation16_spill] sm:$0xff]  ;;  %v3680_v7 = vld [vmem:[#allocation21_spill] sm:$0xff]  ;;  %v3681_v12 = vld [vmem:[#allocation23_spill] sm:$0xff] }
 0x2d0   : > { %v1980_v0 = vpop.eup %1979  ;;  %v3682_v15 = vld [vmem:[#allocation22_spill] sm:$0xff] }
 0x2d1   : > { %v3234_v29 = vadd.f32 %v1105_v58, %v1104_v59  ;;  %v1099_v56 = vadd.f32 1.0, %v1980_v0  ;;  %v3683_v59 = vld [vmem:[#allocation24_spill] sm:$0xff]  ;;  %v3684_v58 = vld [vmem:[#allocation25_spill] sm:$0xff]  ;;  %v3685_v0 = vld [vmem:[#allocation27_spill] sm:$0xff] }
 0x2d3   : > { %1981 = vtanh.f32 %v3234_v29  ;;  %v1102_v53 = vmul.f32 0.5, %v1099_v56  ;;  %v3686_v56 = vld [vmem:[#allocation26_spill] sm:$0xff] }
 0x2d9   : > { %v1982_v54 = vpop.eup %1981 }
 0x2da   : > { %v1108_v57 = vmul.f32 %v1982_v54, %v1102_v53  ;;  %v3687_v53 = vld [vmem:[#allocation28_spill] sm:$0xff]  ;;  %v3688_v54 = vld [vmem:[#allocation29_spill] sm:$0xff] }
 0x2dc   : > { %1132 = vmatmul.f32.vlgmr.msrb.gmra.mxu0 %v1108_v57  ;;  %1152 = vmatmul.f32.vlgmr.msrb.gmra.mxu1 %v1108_v57 }
 0x2dd   : > { %1172 = vmatmul.f32.vlgmr.msrb.gmra.mxu2 %v1108_v57  ;;  %1192 = vmatmul.f32.vlgmr.msrb.gmra.mxu3 %v1108_v57  ;;  %v3689_v57 = vld [vmem:[#allocation31_spill] sm:$0xff] }
 0x2de   : > { %1334 = vmatpush.msrb.mxu0 %v3037_v16  ;;  %1354 = vmatpush.msrb.mxu1 %v3040_v4 }
 0x2df   : > { %1374 = vmatpush.msrb.mxu2 %v3043_v63  ;;  %1394 = vmatpush.msrb.mxu3 %v3046_v61 }
 0x2e0   : > { %1335 = vmatpush.msrb.mxu0 %v3049_v8  ;;  %1355 = vmatpush.msrb.mxu1 %v3052_v6 }
 0x2e1   : > { %1375 = vmatpush.msrb.mxu2 %v3055_v9  ;;  %1395 = vmatpush.msrb.mxu3 %v3058_v3 }
 0x2e2   : > { %1336 = vmatpush.msrb.mxu0 %v3061_v11  ;;  %1356 = vmatpush.msrb.mxu1 %v3064_v60 }
 0x2e3   : > { %1376 = vmatpush.msrb.mxu2 %v3067_v42  ;;  %1396 = vmatpush.msrb.mxu3 %v3070_v55 }
 0x2e4   : > { %1337 = vmatpush.msrb.mxu0 %v3073_v13  ;;  %1357 = vmatpush.msrb.mxu1 %v3076_v5 }
 0x2e5   : > { %1377 = vmatpush.msrb.mxu2 %v3079_v17  ;;  %1397 = vmatpush.msrb.mxu3 %v3082_v18 }
 0x2e6   : > { %1338 = vmatpush.msrb.mxu0 %v3085_v19  ;;  %1358 = vmatpush.msrb.mxu1 %v3088_v20 }
 0x2e7   : > { %1378 = vmatpush.msrb.mxu2 %v3091_v21  ;;  %1398 = vmatpush.msrb.mxu3 %v3094_v22 }
 0x2e8   : > { %1339 = vmatpush.msrb.mxu0 %v3097_v23  ;;  %1359 = vmatpush.msrb.mxu1 %v3100_v24 }
 0x2e9   : > { %1379 = vmatpush.msrb.mxu2 %v3103_v25  ;;  %1399 = vmatpush.msrb.mxu3 %v3106_v26 }
 0x2ea   : > { %1340 = vmatpush.msrb.mxu0 %v3109_v27  ;;  %1360 = vmatpush.msrb.mxu1 %v3112_v28 }
 0x2eb   : > { %1380 = vmatpush.msrb.mxu2 %v3115_v30  ;;  %1400 = vmatpush.msrb.mxu3 %v3118_v31 }
 0x2ec   : > { %1341 = vmatpush.msrb.mxu0 %v3121_v32  ;;  %1361 = vmatpush.msrb.mxu1 %v3124_v33 }
 0x2ed   : > { %1381 = vmatpush.msrb.mxu2 %v3127_v34  ;;  %1401 = vmatpush.msrb.mxu3 %v3130_v35 }
 0x2ee   : > { %1342 = vmatpush.msrb.mxu0 %v3133_v36  ;;  %1362 = vmatpush.msrb.mxu1 %v3136_v37 }
 0x2ef   : > { %1382 = vmatpush.msrb.mxu2 %v3139_v38  ;;  %1402 = vmatpush.msrb.mxu3 %v3142_v39 }
 0x2f0   : > { %1343 = vmatpush.msrb.mxu0 %v3145_v40  ;;  %1363 = vmatpush.msrb.mxu1 %v3148_v41 }
 0x2f1   : > { %1383 = vmatpush.msrb.mxu2 %v3151_v43  ;;  %1403 = vmatpush.msrb.mxu3 %v3154_v44 }
 0x2f2   : > { %1344 = vmatpush.msrb.mxu0 %v3157_v45  ;;  %1364 = vmatpush.msrb.mxu1 %v3160_v46 }
 0x2f3   : > { %1384 = vmatpush.msrb.mxu2 %v3163_v47  ;;  %1404 = vmatpush.msrb.mxu3 %v3166_v48 }
 0x2f4   : > { %1345 = vmatpush.msrb.mxu0 %v3671_v14  ;;  %1365 = vmatpush.msrb.mxu1 %v3672_v49 }
 0x2f5   : > { %1385 = vmatpush.msrb.mxu2 %v3673_v50  ;;  %1405 = vmatpush.msrb.mxu3 %v3674_v51  ;;  %v3694_v51 = vld [vmem:[#allocation55_spill] sm:$0xff] }
 0x2f6   : > { %1346 = vmatpush.msrb.mxu0 %v3675_v52  ;;  %1366 = vmatpush.msrb.mxu1 %v3676_v10  ;;  %v3693_v52 = vld [vmem:[#allocation54_spill] sm:$0xff] }
 0x2f7   : > { %1386 = vmatpush.msrb.mxu2 %v3677_v1  ;;  %1406 = vmatpush.msrb.mxu3 %v3678_v62  ;;  %v3691_v62 = vld [vmem:[#allocation52_spill] sm:$0xff]  ;;  %v3692_v1 = vld [vmem:[#allocation53_spill] sm:$0xff] }
 0x2f8   : > { %1347 = vmatpush.msrb.mxu0 %v3679_v2  ;;  %1367 = vmatpush.msrb.mxu1 %v3680_v7  ;;  %v3690_v2 = vld [vmem:[#allocation30_spill] sm:$0xff] }
 0x2f9   : > { %1387 = vmatpush.msrb.mxu2 %v3681_v12  ;;  %1407 = vmatpush.msrb.mxu3 %v3682_v15 }
 0x2fa   : > { %1348 = vmatpush.msrb.mxu0 %v3683_v59  ;;  %1368 = vmatpush.msrb.mxu1 %v3684_v58 }
 0x2fb   : > { %1388 = vmatpush.msrb.mxu2 %v3685_v0  ;;  %1408 = vmatpush.msrb.mxu3 %v3686_v56 }
 0x2fc   : > { %1349 = vmatpush.msrb.mxu0 %v3687_v53  ;;  %1369 = vmatpush.msrb.mxu1 %v3688_v54 }
 0x2fd   : > { %1389 = vmatpush.msrb.mxu2 %v3689_v57  ;;  %1409 = vmatpush.msrb.mxu3 %v3690_v2 }
 0x359   : > { %v1133_v7 = vpop.f32.mrf.mxu0  ;;  %v1153_v12 = vpop.f32.mrf.mxu1 }
 0x35a   : > { %v1196_v15 = vadd.f32 %v1133_v7, %v3691_v62  ;;  %v1197_v59 = vadd.f32 %v1153_v12, %v3692_v1 }
 0x35c   : > { %v1200_v10 = vmul.f32 0.5, %v1196_v15  ;;  %v1201_v58 = vmul.f32 0.5, %v1197_v59 }
 0x35e   : > { %1983 = vtanh.f32 %v1200_v10 }
 0x35f   : > { %1985 = vtanh.f32 %v1201_v58 }
 0x360   : > { %v1173_v0 = vpop.f32.mrf.mxu2  ;;  %v1193_v56 = vpop.f32.mrf.mxu3 }
 0x361   : > { %v1198_v53 = vadd.f32 %v1173_v0, %v3693_v52  ;;  %v1199_v54 = vadd.f32 %v1193_v56, %v3694_v51 }
 0x363   : > { %v1202_v50 = vmul.f32 0.5, %v1198_v53  ;;  %1987 = vtanh.f32 %v1199_v54  ;;  %v1575_v53 = vld [vmem:[#allocation6 + $0xf0] sm:$0xff]  ;;  %v1576_v54 = vld [vmem:[#allocation6 + $0xf8] sm:$0xff] }
 0x364   : > { %v1984_v57 = vpop.eup %1983 }
 0x365   : > { %v1986_v2 = vpop.eup %1985  ;;  %v1206_v49 = vadd.f32 1.0, %v1984_v57  ;;  %1989 = vtanh.f32 %v1202_v50 }
 0x366   : > { %v1207_v14 = vadd.f32 1.0, %v1986_v2 }
 0x367   : > { %v1209_v62 = vmul.f32 0.5, %v1206_v49 }
 0x368   : > { %v1210_v7 = vmul.f32 0.5, %v1207_v14 }
 0x369   : > { %v1988_v1 = vpop.eup %1987 }
 0x36a   : > { %v1213_v12 = vmul.f32 %v1210_v7, %v3234_v29  ;;  %v1214_v10 = vmul.f32 %v1988_v1, %v1209_v62  ;;  %v3719_v7 = vld [vmem:[#allocation60_spill] sm:$0xff] }
 0x36b   : > { %v1990_v15 = vpop.eup %1989 }
 0x36c   : > { %v3306_v59 = vadd.f32 %v1214_v10, %v1213_v12  ;;  %v1208_v52 = vadd.f32 1.0, %v1990_v15  ;;  %v3720_v12 = vld [vmem:[#allocation61_spill] sm:$0xff] }
 0x36e   : > { %1991 = vtanh.f32 %v3306_v59  ;;  %v1211_v51 = vmul.f32 0.5, %v1208_v52 }
 0x374   : > { %v1992_v58 = vpop.eup %1991 }
 0x375   : > { %v1217_v0 = vmul.f32 %v1992_v58, %v1211_v51  ;;  %v3721_v58 = vld [vmem:[#allocation62_spill] sm:$0xff] }
 0x377   : > { %1241 = vmatmul.f32.vlgmr.msra.gmra.mxu0 %v1217_v0  ;;  %1261 = vmatmul.f32.vlgmr.msra.gmra.mxu1 %v1217_v0 }
 0x378   : > { %1281 = vmatmul.f32.vlgmr.msra.gmra.mxu2 %v1217_v0  ;;  %1301 = vmatmul.f32.vlgmr.msra.gmra.mxu3 %v1217_v0 }
 0x379   : > { %1443 = vmatpush.msra.mxu0 %v3037_v16  ;;  %1463 = vmatpush.msra.mxu1 %v3040_v4  ;;  %v3695_v16 = vld [vmem:[#allocation16_spill] sm:$0xff]  ;;  %v3696_v4 = vld [vmem:[#allocation17_spill] sm:$0xff] }
 0x37a   : > { %1483 = vmatpush.msra.mxu2 %v3043_v63  ;;  %1503 = vmatpush.msra.mxu3 %v3046_v61  ;;  %v3697_v63 = vld [vmem:[#allocation19_spill] sm:$0xff]  ;;  %v3698_v61 = vld [vmem:[#allocation18_spill] sm:$0xff] }
 0x37b   : > { %1444 = vmatpush.msra.mxu0 %v3049_v8  ;;  %1464 = vmatpush.msra.mxu1 %v3052_v6  ;;  %v3699_v8 = vld [vmem:[#allocation40_spill] sm:$0xff]  ;;  %v3700_v6 = vld [vmem:[#allocation41_spill] sm:$0xff] }
 0x37c   : > { %1484 = vmatpush.msra.mxu2 %v3055_v9  ;;  %1504 = vmatpush.msra.mxu3 %v3058_v3  ;;  %v3701_v9 = vld [vmem:[#allocation42_spill] sm:$0xff]  ;;  %v3702_v3 = vld [vmem:[#allocation43_spill] sm:$0xff] }
 0x37d   : > { %1445 = vmatpush.msra.mxu0 %v3061_v11  ;;  %1465 = vmatpush.msra.mxu1 %v3064_v60  ;;  %v3703_v11 = vld [vmem:[#allocation20_spill] sm:$0xff]  ;;  %v3704_v60 = vld [vmem:[#allocation21_spill] sm:$0xff] }
 0x37e   : > { %1485 = vmatpush.msra.mxu2 %v3067_v42  ;;  %1505 = vmatpush.msra.mxu3 %v3070_v55  ;;  %v3705_v42 = vld [vmem:[#allocation23_spill] sm:$0xff]  ;;  %v3706_v55 = vld [vmem:[#allocation22_spill] sm:$0xff] }
 0x37f   : > { %1446 = vmatpush.msra.mxu0 %v3073_v13  ;;  %1466 = vmatpush.msra.mxu1 %v3076_v5  ;;  %v3707_v13 = vld [vmem:[#allocation24_spill] sm:$0xff]  ;;  %v3708_v5 = vld [vmem:[#allocation25_spill] sm:$0xff] }
 0x380   : > { %1486 = vmatpush.msra.mxu2 %v3079_v17  ;;  %1506 = vmatpush.msra.mxu3 %v3082_v18  ;;  %v3709_v17 = vld [vmem:[#allocation27_spill] sm:$0xff]  ;;  %v3710_v18 = vld [vmem:[#allocation26_spill] sm:$0xff] }
 0x381   : > { %1447 = vmatpush.msra.mxu0 %v3085_v19  ;;  %1467 = vmatpush.msra.mxu1 %v3088_v20  ;;  %v3711_v19 = vld [vmem:[#allocation28_spill] sm:$0xff]  ;;  %v3712_v20 = vld [vmem:[#allocation29_spill] sm:$0xff] }
 0x382   : > { %1487 = vmatpush.msra.mxu2 %v3091_v21  ;;  %1507 = vmatpush.msra.mxu3 %v3094_v22  ;;  %v3713_v21 = vld [vmem:[#allocation31_spill] sm:$0xff]  ;;  %v3714_v22 = vld [vmem:[#allocation30_spill] sm:$0xff] }
 0x383   : > { %1448 = vmatpush.msra.mxu0 %v3097_v23  ;;  %1468 = vmatpush.msra.mxu1 %v3100_v24 }
 0x384   : > { %1488 = vmatpush.msra.mxu2 %v3103_v25  ;;  %1508 = vmatpush.msra.mxu3 %v3106_v26  ;;  %v3715_v25 = vld [vmem:[#allocation56_spill] sm:$0xff] }
 0x385   : > { %1449 = vmatpush.msra.mxu0 %v3109_v27  ;;  %1469 = vmatpush.msra.mxu1 %v3112_v28  ;;  %v3716_v27 = vld [vmem:[#allocation57_spill] sm:$0xff] }
 0x386   : > { %1489 = vmatpush.msra.mxu2 %v3115_v30  ;;  %1509 = vmatpush.msra.mxu3 %v3118_v31 }
 0x387   : > { %1450 = vmatpush.msra.mxu0 %v3121_v32  ;;  %1470 = vmatpush.msra.mxu1 %v3124_v33 }
 0x388   : > { %1490 = vmatpush.msra.mxu2 %v3127_v34  ;;  %1510 = vmatpush.msra.mxu3 %v3130_v35  ;;  %v3717_v34 = vld [vmem:[#allocation58_spill] sm:$0xff] }
 0x389   : > { %1451 = vmatpush.msra.mxu0 %v3133_v36  ;;  %1471 = vmatpush.msra.mxu1 %v3136_v37  ;;  %v3718_v36 = vld [vmem:[#allocation59_spill] sm:$0xff] }
 0x38a   : > { %1491 = vmatpush.msra.mxu2 %v3139_v38  ;;  %1511 = vmatpush.msra.mxu3 %v3142_v39 }
 0x38b   : > { %1452 = vmatpush.msra.mxu0 %v3145_v40  ;;  %1472 = vmatpush.msra.mxu1 %v3148_v41 }
 0x38c   : > { %1492 = vmatpush.msra.mxu2 %v3151_v43  ;;  %1512 = vmatpush.msra.mxu3 %v3154_v44 }
 0x38d   : > { %1453 = vmatpush.msra.mxu0 %v3157_v45  ;;  %1473 = vmatpush.msra.mxu1 %v3160_v46 }
 0x38e   : > { %1493 = vmatpush.msra.mxu2 %v3163_v47  ;;  %1513 = vmatpush.msra.mxu3 %v3166_v48 }
 0x38f   : > { %1454 = vmatpush.msra.mxu0 %v3695_v16  ;;  %1474 = vmatpush.msra.mxu1 %v3696_v4  ;;  %v3722_v16 = vld [vmem:[#allocation63_spill] sm:$0xff] }
 0x390   : > { %1494 = vmatpush.msra.mxu2 %v3697_v63  ;;  %1514 = vmatpush.msra.mxu3 %v3698_v61 }
 0x391   : > { %1455 = vmatpush.msra.mxu0 %v3699_v8  ;;  %1475 = vmatpush.msra.mxu1 %v3700_v6 }
 0x392   : > { %1495 = vmatpush.msra.mxu2 %v3701_v9  ;;  %1515 = vmatpush.msra.mxu3 %v3702_v3 }
 0x393   : > { %1456 = vmatpush.msra.mxu0 %v3703_v11  ;;  %1476 = vmatpush.msra.mxu1 %v3704_v60 }
 0x394   : > { %1496 = vmatpush.msra.mxu2 %v3705_v42  ;;  %1516 = vmatpush.msra.mxu3 %v3706_v55 }
 0x395   : > { %1457 = vmatpush.msra.mxu0 %v3707_v13  ;;  %1477 = vmatpush.msra.mxu1 %v3708_v5 }
 0x396   : > { %1497 = vmatpush.msra.mxu2 %v3709_v17  ;;  %1517 = vmatpush.msra.mxu3 %v3710_v18 }
 0x397   : > { %1458 = vmatpush.msra.mxu0 %v3711_v19  ;;  %1478 = vmatpush.msra.mxu1 %v3712_v20 }
 0x398   : > { %1498 = vmatpush.msra.mxu2 %v3713_v21  ;;  %1518 = vmatpush.msra.mxu3 %v3714_v22  ;;  %v1573_v21 = vld [vmem:[#allocation6 + $0xe0] sm:$0xff]  ;;  %v1574_v22 = vld [vmem:[#allocation6 + $0xe8] sm:$0xff] }
 0x3f4   : > { %v1242_v23 = vpop.f32.mrf.mxu0  ;;  %v1262_v24 = vpop.f32.mrf.mxu1 }
 0x3f5   : > { %v1305_v26 = vadd.f32 %v1242_v23, %v3715_v25  ;;  %v1306_v28 = vadd.f32 %v1262_v24, %v3716_v27  ;;  %v1571_v23 = vld [vmem:[#allocation6 + $0xd0] sm:$0xff]  ;;  %v1572_v24 = vld [vmem:[#allocation6 + $0xd8] sm:$0xff]  ;;  %v1569_v25 = vld [vmem:[#allocation6 + $0xc0] sm:$0xff] }
 0x3f6   : > { %v1567_v27 = vld [vmem:[#allocation6 + $0xb0] sm:$0xff] }
 0x3f7   : > { %v1309_v30 = vmul.f32 0.5, %v1305_v26  ;;  %v1310_v31 = vmul.f32 0.5, %v1306_v28  ;;  %v1570_v26 = vld [vmem:[#allocation6 + $0xc8] sm:$0xff]  ;;  %v1568_v28 = vld [vmem:[#allocation6 + $0xb8] sm:$0xff] }
 0x3f9   : > { %1993 = vtanh.f32 %v1309_v30  ;;  %v1565_v30 = vld [vmem:[#allocation6 + $0xa0] sm:$0xff] }
 0x3fa   : > { %1995 = vtanh.f32 %v1310_v31  ;;  %v1566_v31 = vld [vmem:[#allocation6 + $0xa8] sm:$0xff] }
 0x3fb   : > { %v1282_v32 = vpop.f32.mrf.mxu2  ;;  %v1302_v33 = vpop.f32.mrf.mxu3 }
 0x3fc   : > { %v1307_v35 = vadd.f32 %v1282_v32, %v3717_v34  ;;  %v1308_v37 = vadd.f32 %v1302_v33, %v3718_v36  ;;  %v1563_v32 = vld [vmem:[#allocation6 + $0x90] sm:$0xff]  ;;  %v1564_v33 = vld [vmem:[#allocation6 + $0x98] sm:$0xff]  ;;  %v1561_v34 = vld [vmem:[#allocation6 + $0x80] sm:$0xff] }
 0x3fd   : > { %v1559_v36 = vld [vmem:[#allocation6 + $0x70] sm:$0xff] }
 0x3fe   : > { %v1311_v38 = vmul.f32 0.5, %v1307_v35  ;;  %1997 = vtanh.f32 %v1308_v37  ;;  %v1562_v35 = vld [vmem:[#allocation6 + $0x88] sm:$0xff]  ;;  %v1560_v37 = vld [vmem:[#allocation6 + $0x78] sm:$0xff] }
 0x3ff   : > { %v1994_v39 = vpop.eup %1993 }
 0x400   : > { %v1996_v40 = vpop.eup %1995  ;;  %v1315_v41 = vadd.f32 1.0, %v1994_v39  ;;  %1999 = vtanh.f32 %v1311_v38  ;;  %v1557_v38 = vld [vmem:[#allocation6 + $0x60] sm:$0xff]  ;;  %v1558_v39 = vld [vmem:[#allocation6 + $0x68] sm:$0xff] }
 0x401   : > { %v1316_v43 = vadd.f32 1.0, %v1996_v40  ;;  %v1555_v40 = vld [vmem:[#allocation6 + $0x50] sm:$0xff] }
 0x402   : > { %v1318_v44 = vmul.f32 0.5, %v1315_v41  ;;  %v1556_v41 = vld [vmem:[#allocation6 + $0x58] sm:$0xff] }
 0x403   : > { %v1319_v45 = vmul.f32 0.5, %v1316_v43  ;;  %v1553_v43 = vld [vmem:[#allocation6 + $0x40] sm:$0xff] }
 0x404   : > { %v1998_v46 = vpop.eup %1997 }
 0x405   : > { %v1322_v47 = vmul.f32 %v1319_v45, %v3306_v59  ;;  %v1323_v48 = vmul.f32 %v1998_v46, %v1318_v44  ;;  %v1554_v44 = vld [vmem:[#allocation6 + $0x48] sm:$0xff]  ;;  %v1551_v45 = vld [vmem:[#allocation6 + $0x30] sm:$0xff]  ;;  %v1552_v46 = vld [vmem:[#allocation6 + $0x38] sm:$0xff] }
 0x406   : > { %v2000_v29 = vpop.eup %1999 }
 0x407   : > { %v1324_v14 = vadd.f32 %v1323_v48, %v1322_v47  ;;  %v1317_v49 = vadd.f32 1.0, %v2000_v29  ;;  %v1549_v47 = vld [vmem:[#allocation6 + $0x20] sm:$0xff]  ;;  %v1550_v48 = vld [vmem:[#allocation6 + $0x28] sm:$0xff]  ;;  %v1547_v29 = vld [vmem:[#allocation6 + $0x10] sm:$0xff] }
 0x409   : > { %2001 = vtanh.f32 %v1324_v14  ;;  %v1320_v50 = vmul.f32 0.5, %v1317_v49  ;;  %v1545_v49 = vld [vmem:[#allocation6] sm:$0xff] }
 0x40f   : > { %v2002_v2 = vpop.eup %2001 }
 0x410   : > { %v1326_v56 = vmul.f32 %v2002_v2, %v1320_v50  ;;  %v1546_v50 = vld [vmem:[#allocation6 + $0x8] sm:$0xff]  ;;  %v1640_v2 = vld [vmem:[#allocation8 + $0x78] sm:$0xff] }
 0x412   : > { %1350 = vmatmul.f32.vlgmr.msrb.gmra.mxu0 %v1326_v56  ;;  %1370 = vmatmul.f32.vlgmr.msrb.gmra.mxu1 %v1326_v56 }
 0x413   : > { %1390 = vmatmul.f32.vlgmr.msrb.gmra.mxu2 %v1326_v56  ;;  %1410 = vmatmul.f32.vlgmr.msrb.gmra.mxu3 %v1326_v56  ;;  %v1656_v56 = vld [vmem:[#allocation8 + $0xf8] sm:$0xff] }
 0x414   : > { %1583 = vmatpush.msrb.mxu0 %v1575_v53  ;;  %1603 = vmatpush.msrb.mxu1 %v1576_v54  ;;  %v1639_v53 = vld [vmem:[#allocation8 + $0x70] sm:$0xff] }
 0x415   : > { %1661 = vmatpush.msrb.mxu2 %v1640_v2  ;;  %1681 = vmatpush.msrb.mxu3 %v1656_v56  ;;  %v1655_v54 = vld [vmem:[#allocation8 + $0xf0] sm:$0xff] }
 0x416   : > { %1584 = vmatpush.msrb.mxu0 %v1573_v21  ;;  %1604 = vmatpush.msrb.mxu1 %v1574_v22  ;;  %v1632_v22 = vld [vmem:[#allocation8 + $0x38] sm:$0xff] }
 0x417   : > { %1662 = vmatpush.msrb.mxu2 %v1639_v53  ;;  %1682 = vmatpush.msrb.mxu3 %v1655_v54 }
 0x418   : > { %1585 = vmatpush.msrb.mxu0 %v1571_v23  ;;  %1605 = vmatpush.msrb.mxu1 %v1572_v24  ;;  %v1648_v23 = vld [vmem:[#allocation8 + $0xb8] sm:$0xff] }
 0x41a   : > { %1586 = vmatpush.msrb.mxu0 %v1569_v25  ;;  %1606 = vmatpush.msrb.mxu1 %v1570_v26  ;;  %v1631_v26 = vld [vmem:[#allocation8 + $0x30] sm:$0xff] }
 0x41c   : > { %1587 = vmatpush.msrb.mxu0 %v1567_v27  ;;  %1607 = vmatpush.msrb.mxu1 %v1568_v28  ;;  %v1647_v27 = vld [vmem:[#allocation8 + $0xb0] sm:$0xff] }
 0x41e   : > { %1588 = vmatpush.msrb.mxu0 %v1565_v30  ;;  %1608 = vmatpush.msrb.mxu1 %v1566_v31  ;;  %v1630_v31 = vld [vmem:[#allocation8 + $0x28] sm:$0xff] }
 0x420   : > { %1589 = vmatpush.msrb.mxu0 %v1563_v32  ;;  %1609 = vmatpush.msrb.mxu1 %v1564_v33  ;;  %v1646_v32 = vld [vmem:[#allocation8 + $0xa8] sm:$0xff] }
 0x422   : > { %1590 = vmatpush.msrb.mxu0 %v1561_v34  ;;  %1610 = vmatpush.msrb.mxu1 %v1562_v35  ;;  %v1629_v35 = vld [vmem:[#allocation8 + $0x20] sm:$0xff] }
 0x424   : > { %1591 = vmatpush.msrb.mxu0 %v1559_v36  ;;  %1611 = vmatpush.msrb.mxu1 %v1560_v37  ;;  %v1645_v36 = vld [vmem:[#allocation8 + $0xa0] sm:$0xff] }
 0x426   : > { %1592 = vmatpush.msrb.mxu0 %v1557_v38  ;;  %1612 = vmatpush.msrb.mxu1 %v1558_v39  ;;  %v1628_v39 = vld [vmem:[#allocation8 + $0x18] sm:$0xff] }
 0x428   : > { %1593 = vmatpush.msrb.mxu0 %v1555_v40  ;;  %1613 = vmatpush.msrb.mxu1 %v1556_v41  ;;  %v1644_v40 = vld [vmem:[#allocation8 + $0x98] sm:$0xff] }
 0x42a   : > { %1594 = vmatpush.msrb.mxu0 %v1553_v43  ;;  %1614 = vmatpush.msrb.mxu1 %v1554_v44 }
 0x42c   : > { %1595 = vmatpush.msrb.mxu0 %v1551_v45  ;;  %1615 = vmatpush.msrb.mxu1 %v1552_v46  ;;  %v1627_v45 = vld [vmem:[#allocation8 + $0x10] sm:$0xff] }
 0x42d   : > { %v1643_v46 = vld [vmem:[#allocation8 + $0x90] sm:$0xff] }
 0x42e   : > { %1596 = vmatpush.msrb.mxu0 %v1549_v47  ;;  %1616 = vmatpush.msrb.mxu1 %v1550_v48  ;;  %v1626_v47 = vld [vmem:[#allocation8 + $0x8] sm:$0xff] }
 0x42f   : > { %v1642_v48 = vld [vmem:[#allocation8 + $0x88] sm:$0xff] }
 0x430   : > { %1597 = vmatpush.msrb.mxu0 %v1547_v29  ;;  %v1625_v29 = vld [vmem:[#allocation8] sm:$0xff] }
 0x432   : > { %1598 = vmatpush.msrb.mxu0 %v1545_v49  ;;  %v1577_v49 = vld [vmem:[%s3433_s5] sm:$0x3] }
 0x433   : > { %v1580_v2 = vperm.slane %v1577_v49, 1 }
 0x48f   : > { %v1351_v57 = vpop.f32.mrf.mxu0  ;;  %v1371_v62 = vpop.f32.mrf.mxu1 }
 0x490   : > { %v1414_v1 = vadd.f32 %v1351_v57, %v3719_v7  ;;  %v1415_v10 = vadd.f32 %v1371_v62, %v3720_v12  ;;  %v1638_v7 = vld [vmem:[#allocation8 + $0x68] sm:$0xff]  ;;  %v3723_v12 = vld [vmem:[#allocation64_spill] sm:$0xff] }
 0x491   : > { %1663 = vmatpush.msrb.mxu2 %v1638_v7 }
 0x492   : > { %v1418_v15 = vmul.f32 0.5, %v1414_v1  ;;  %v1419_v59 = vmul.f32 0.5, %v1415_v10  ;;  %v1654_v1 = vld [vmem:[#allocation8 + $0xe8] sm:$0xff] }
 0x493   : > { %1683 = vmatpush.msrb.mxu3 %v1654_v1  ;;  %v1942_v1 = vld [vmem:[%s3435_s7] ss:$0 sm:$0xff] }
 0x494   : > { %2003 = vtanh.f32 %v1418_v15  ;;  %v3724_v15 = vld [vmem:[#allocation65_spill] sm:$0xff] }
 0x495   : > { %2005 = vtanh.f32 %v1419_v59 }
 0x496   : > { %v1391_v52 = vpop.f32.mrf.mxu2  ;;  %v1411_v51 = vpop.f32.mrf.mxu3 }
 0x497   : > { %v1416_v0 = vadd.f32 %v1391_v52, %v3721_v58  ;;  %v1417_v4 = vadd.f32 %v1411_v51, %v3722_v16  ;;  %v1637_v52 = vld [vmem:[#allocation8 + $0x60] sm:$0xff]  ;;  %v1636_v16 = vld [vmem:[#allocation8 + $0x58] sm:$0xff] }
 0x498   : > { %v1653_v51 = vld [vmem:[#allocation8 + $0xe0] sm:$0xff]  ;;  %1664 = vmatpush.msrb.mxu2 %v1637_v52 }
 0x499   : > { %v1420_v63 = vmul.f32 0.5, %v1416_v0  ;;  %2007 = vtanh.f32 %v1417_v4  ;;  %v1652_v4 = vld [vmem:[#allocation8 + $0xd8] sm:$0xff]  ;;  %1684 = vmatpush.msrb.mxu3 %v1653_v51 }
 0x49a   : > { %v2004_v61 = vpop.eup %2003  ;;  %1665 = vmatpush.msrb.mxu2 %v1636_v16 }
 0x49b   : > { %v2006_v8 = vpop.eup %2005  ;;  %v1424_v6 = vadd.f32 1.0, %v2004_v61  ;;  %2009 = vtanh.f32 %v1420_v63  ;;  %v1635_v63 = vld [vmem:[#allocation8 + $0x50] sm:$0xff]  ;;  %1685 = vmatpush.msrb.mxu3 %v1652_v4 }
 0x49c   : > { %v1425_v9 = vadd.f32 1.0, %v2006_v8  ;;  %v1651_v61 = vld [vmem:[#allocation8 + $0xd0] sm:$0xff]  ;;  %1666 = vmatpush.msrb.mxu2 %v1635_v63 }
 0x49d   : > { %v1427_v3 = vmul.f32 0.5, %v1424_v6  ;;  %1686 = vmatpush.msrb.mxu3 %v1651_v61 }
 0x49e   : > { %v1428_v11 = vmul.f32 0.5, %v1425_v9  ;;  %v3725_v9 = vld [vmem:[#allocation66_spill] sm:$0xff] }
 0x49f   : > { %v2008_v60 = vpop.eup %2007 }
 0x4a0   : > { %v1431_v42 = vmul.f32 %v1428_v11, %v1324_v14  ;;  %v1432_v55 = vmul.f32 %v2008_v60, %v1427_v3  ;;  %v1548_v14 = vld [vmem:[#allocation6 + $0x18] sm:$0xff]  ;;  %v3726_v11 = vld [vmem:[#allocation67_spill] sm:$0xff] }
 0x4a1   : > { %v2010_v13 = vpop.eup %2009  ;;  %1617 = vmatpush.msrb.mxu1 %v1548_v14  ;;  %v1641_v14 = vld [vmem:[#allocation8 + $0x80] sm:$0xff] }
 0x4a2   : > { %v3382_v5 = vadd.f32 %v1432_v55, %v1431_v42  ;;  %v1426_v17 = vadd.f32 1.0, %v2010_v13  ;;  %v1634_v42 = vld [vmem:[#allocation8 + $0x48] sm:$0xff] }
 0x4a3   : > { %1618 = vmatpush.msrb.mxu1 %v1546_v50  ;;  %v1650_v55 = vld [vmem:[#allocation8 + $0xc8] sm:$0xff]  ;;  %1667 = vmatpush.msrb.mxu2 %v1634_v42  ;;  %v1579_v50 = vperm.slane %v1577_v49, 0 }
 0x4a4   : > { %2011 = vtanh.f32 %v3382_v5  ;;  %v1429_v18 = vmul.f32 0.5, %v1426_v17  ;;  %v1633_v17 = vld [vmem:[#allocation8 + $0x40] sm:$0xff]  ;;  %1687 = vmatpush.msrb.mxu3 %v1650_v55 }
 0x4a5   : > { %1668 = vmatpush.msrb.mxu2 %v1633_v17 }
 0x4a7   : > { %1669 = vmatpush.msrb.mxu2 %v1632_v22 }
 0x4a9   : > { %1670 = vmatpush.msrb.mxu2 %v1631_v26 }
 0x4aa   : > { %v2012_v19 = vpop.eup %2011 }
 0x4ab   : > { %v1435_v20 = vmul.f32 %v2012_v19, %v1429_v18  ;;  %v1649_v18 = vld [vmem:[#allocation8 + $0xc0] sm:$0xff]  ;;  %1671 = vmatpush.msrb.mxu2 %v1630_v31 }
 0x4ac   : > { %1688 = vmatpush.msrb.mxu3 %v1649_v18 }
 0x4ad   : > { %1459 = vmatmul.f32.vlgmr.msra.gmra.mxu0 %v1435_v20  ;;  %1479 = vmatmul.f32.vlgmr.msra.gmra.mxu1 %v1435_v20 }
 0x4ae   : > { %1499 = vmatmul.f32.vlgmr.msra.gmra.mxu2 %v1435_v20  ;;  %1519 = vmatmul.f32.vlgmr.msra.gmra.mxu3 %v1435_v20 }
 0x4af   : > { %1689 = vmatpush.msrb.mxu3 %v1648_v23  ;;  %1672 = vmatpush.msrb.mxu2 %v1629_v35 }
 0x4b1   : > { %1690 = vmatpush.msrb.mxu3 %v1647_v27  ;;  %1673 = vmatpush.msrb.mxu2 %v1628_v39 }
 0x4b3   : > { %1691 = vmatpush.msrb.mxu3 %v1646_v32  ;;  %1674 = vmatpush.msrb.mxu2 %v1627_v45 }
 0x4b5   : > { %1692 = vmatpush.msrb.mxu3 %v1645_v36  ;;  %1675 = vmatpush.msrb.mxu2 %v1626_v47 }
 0x4b7   : > { %1693 = vmatpush.msrb.mxu3 %v1644_v40  ;;  %1676 = vmatpush.msrb.mxu2 %v1625_v29 }
 0x4b9   : > { %1694 = vmatpush.msrb.mxu3 %v1643_v46 }
 0x4bb   : > { %1695 = vmatpush.msrb.mxu3 %v1642_v48 }
 0x4bd   : > { %1696 = vmatpush.msrb.mxu3 %v1641_v14 }
 0x52a   : > { %v1460_v57 = vpop.f32.mrf.mxu0  ;;  %v1480_v62 = vpop.f32.mrf.mxu1 }
 0x52b   : > { %v1523_v10 = vadd.f32 %v1460_v57, %v3723_v12  ;;  %v1524_v59 = vadd.f32 %v1480_v62, %v3724_v15 }
 0x52d   : > { %v1527_v58 = vmul.f32 0.5, %v1523_v10  ;;  %v1528_v0 = vmul.f32 0.5, %v1524_v59 }
 0x52f   : > { %2013 = vtanh.f32 %v1527_v58 }
 0x530   : > { %2015 = vtanh.f32 %v1528_v0 }
 0x531   : > { %v1500_v8 = vpop.f32.mrf.mxu2  ;;  %v1520_v6 = vpop.f32.mrf.mxu3 }
 0x532   : > { %v1525_v3 = vadd.f32 %v1500_v8, %v3725_v9  ;;  %v1526_v60 = vadd.f32 %v1520_v6, %v3726_v11 }
 0x534   : > { %v1529_v13 = vmul.f32 0.5, %v1525_v3  ;;  %2017 = vtanh.f32 %v1526_v60 }
 0x535   : > { %v2014_v19 = vpop.eup %2013 }
 0x536   : > { %v2016_v20 = vpop.eup %2015  ;;  %v1533_v21 = vadd.f32 1.0, %v2014_v19  ;;  %2019 = vtanh.f32 %v1529_v13 }
 0x537   : > { %v1534_v24 = vadd.f32 1.0, %v2016_v20 }
 0x538   : > { %v1536_v25 = vmul.f32 0.5, %v1533_v21 }
 0x539   : > { %v1537_v28 = vmul.f32 0.5, %v1534_v24 }
 0x53a   : > { %v2018_v30 = vpop.eup %2017 }
 0x53b   : > { %v1540_v33 = vmul.f32 %v1537_v28, %v3382_v5  ;;  %v1541_v34 = vmul.f32 %v2018_v30, %v1536_v25 }
 0x53c   : > { %v2020_v37 = vpop.eup %2019 }
 0x53d   : > { %v1542_v38 = vadd.f32 %v1541_v34, %v1540_v33  ;;  %v1535_v41 = vadd.f32 1.0, %v2020_v37 }
 0x53f   : > { %2021 = vtanh.f32 %v1542_v38  ;;  %v1538_v43 = vmul.f32 0.5, %v1535_v41 }
 0x545   : > { %v2022_v44 = vpop.eup %2021 }
 0x546   : > { %v1544_v5 = vmul.f32 %v2022_v44, %v1538_v43 }
 0x548   : > { %1599 = vmatmul.f32.vlgmr.msrb.gmra.mxu0 %v1544_v5  ;;  %1619 = vmatmul.f32.vlgmr.msrb.gmra.mxu1 %v1544_v5 }
 0x5c5   : > { %v1600_v56 = vpop.f32.mrf.mxu0  ;;  %v1620_v53 = vpop.f32.mrf.mxu1 }
 0x5c6   : > { %v1601_v54 = vadd.f32 %v1600_v56, %v1579_v50  ;;  %v1621_v57 = vadd.f32 %v1620_v53, %v1580_v2 }
 0x5c8   : > { %v1623_v62 = vmax.f32 %v1601_v54, 0.0  ;;  %v1624_v7 = vmax.f32 %v1621_v57, 0.0 }
 0x5ca   : > { %1677 = vmatmul.f32.vlgmr.msrb.gmra.mxu2 %v1623_v62  ;;  %1697 = vmatmul.f32.vlgmr.msrb.gmra.mxu3 %v1624_v7 }
 0x64d   : > { %v1678_v12 = vpop.f32.mrf.mxu2  ;;  %v1698_v15 = vpop.f32.mrf.mxu3 }
 0x64e   : > { %v1679_v10 = vadd.f32 %v1942_v1, %v1678_v12 }
 0x650   : > { %v1699_v59 = vadd.f32 %v1698_v15, %v1679_v10 }
 0x652   : > { %1701 = vst [vmem:[%s348_s19] sm:$0xff] %v1699_v59 }
 0x653   : > { %2204 = shalt.err (!%p2201_p8)
}
 0x654   : > { %1877 = dma.vmem_to_hbm [thread:$0]  (%p2342_p5), %s1716_s21, 128, %s1718_s24, %s1703_s9  }
 0x655 PF: > { %p1899_p9 = scmp.ge.s32.totalorder %s2247_s30, 2  ;;  %s1729_s17 = sand.u32 1, %s2235_s27  }
 0x656   : > { %s1730_s20 = scalar_lea.sflag [#allocation5], %s1729_s17 }
 0x657   : > { %p1890_p10 = pnand %p1899_p9, %p2346_p6 }
 0x659   : > { %p1891_p11 = pneg %p1890_p10 }
 0x65b   : > { %2230 = dma.done.wait (%p1891_p11), %s1730_s20, 128  }
 0x65c   : > { %2232 = vsyncadd (%p1891_p11), %s1730_s20, 4294967168  ;;  %s3727_s30 = sld [smem:[#allocation14_spill]]  ;;  %s3730_s27 = smov %s2239_s28 }
 0x65d   : > { %s3728_s23 = sld [smem:[#allocation13_spill]] }
 0x65e   : > { %s3729_s29 = sld [smem:[#allocation15_spill]] }
 0x662   : > { %p20_p12 = scmp.ge.s32.totalorder %s3727_s30, 4  }
 0x663   : > { %s3731_s28 = smov %s3728_s23 }
 0x664   :  { %22 = sbr.rel (!%p20_p12) target bundleno = 8 (0x8), region = 108 }
 0x669   :  { %1736 = vsyncpa [#allocation4], 1 }
 0x66a   :  { %1738 = vsyncpa [#allocation4 + $0x1], 1 }
 0x66b   :  { %1739 = vsyncpa [#allocation7], 1 }
 0x66c   :  { %1740 = vsyncpa [#allocation5], 1 }
 0x66d   :  { %1742 = vsyncpa [#allocation5 + $0x1], 1 }

</bundles_post_ra>
